<compile_context>
chip_gen: v5e
topology: v5e:2x2
jax: 0.10.0
libtpu: 0.0.40
codegen_flags: <defaults>
</compile_context>

<pallas_src>
import numpy as np
import jax
import jax.numpy as jnp
from jax import lax
from jax.experimental import pallas as pl
from jax.experimental.pallas import tpu as pltpu

EPS = 1e-5      # BatchNorm2d eps
ALPHA = 0.2     # LeakyReLU negative slope
LANES = 128


def _round_up(x, m):
    return (x + m - 1) // m * m


# --------------------------- parameter preparation ---------------------------

def _spectral_normalize(w_oihw):
    """Divide by exact top singular value of W.view(Co,-1) (spectral_norm fixed point)."""
    mat = np.asarray(w_oihw).reshape(w_oihw.shape[0], -1)
    sigma = np.linalg.svd(mat, compute_uv=False)[0]
    return w_oihw / jnp.float32(sigma)


def _prep_weights(params, cin, cout, cp):
    """Matmul-ready, channel-padded (cout->cp), bf16 weights."""
    # conv1 (4x4/s2/p1) in polyphase form: a 2x2 'valid' conv on the
    # space-to-depth(2) padded input -> one (4*cin, cp) matrix per (a, b).
    w1 = params['w1']                                        # (co, ci, 4, 4)
    w1t = jnp.transpose(w1, (2, 3, 1, 0))                    # (kh, kw, ci, co)
    w1t = w1t.reshape(2, 2, 2, 2, cin, cout)                 # (a, p, b, q, ci, co)
    w1t = jnp.transpose(w1t, (0, 2, 1, 3, 4, 5))             # (a, b, p, q, ci, co)
    w1eq = w1t.reshape(2, 2, 4 * cin, cout)

    # direct branch: AvgPool(2,2)+1x1 conv == sparse 2x2 'valid' conv on the same
    # polyphase input; only phase block (p,q) = (1-a, 1-b) is non-zero (= wd/4).
    wd2 = params['wd'][:, :, 0, 0]                           # (co, ci)
    wdeq = jnp.zeros((2, 2, 4, cin, cout), jnp.float32)
    for a in range(2):
        for b in range(2):
            pq = (1 - a) * 2 + (1 - b)
            wdeq = wdeq.at[a, b, pq].set(wd2.T / 4.0)
    wdeq = wdeq.reshape(2, 2, 4 * cin, cout)

    def pad_out(m):
        return jnp.pad(m, ((0, 0),) * (m.ndim - 1) + ((0, cp - cout),))

    # concat along output channels: cols [:cp] -> z1, cols [cp:] -> z_direct.
    wcomb = jnp.concatenate([pad_out(w1eq), pad_out(wdeq)], axis=-1)
    wcomb = wcomb.reshape(4, 4 * cin, 2 * cp).astype(jnp.bfloat16)

    # conv2 (3x3/s1/p1): one (cp, cp) matrix per tap.
    w2 = params['w2']                                        # (co, co, 3, 3)
    w2t = jnp.transpose(w2, (2, 3, 1, 0)).reshape(9, cout, cout)
    w2p = jnp.zeros((9, cp, cp), jnp.float32).at[:, :cout, :cout].set(w2t)
    return wcomb, w2p.astype(jnp.bfloat16)


def _bn_scale_shift(s, ss, count, gamma, beta, cout, cp):
    """Fold batch sum / sumsq + affine params into y = z*scale + shift  -> (2, cp) f32."""
    mean = s / count
    var = jnp.maximum(ss / count - mean * mean, 0.0)          # biased variance, f32
    inv = lax.rsqrt(var + EPS)
    g = jnp.pad(gamma.reshape(-1).astype(jnp.float32), (0, cp - cout))
    b = jnp.pad(beta.reshape(-1).astype(jnp.float32), (0, cp - cout))
    scale = g * inv
    shift = b - mean * scale
    return jnp.stack([scale, shift], axis=0)                  # row0 = scale, row1 = shift


# ----------------------------------- forward -----------------------------------

@jax.jit
def down_block_forward(x_nchw, params):
    x = jnp.transpose(x_nchw, (0, 2, 3, 1)).astype(jnp.float32)   # NCHW -> NHWC
    n, h, w, cin = x.shape
    cout = params['w1'].shape[0]
    oh, ow = h // 2, w // 2
    m = n * oh * ow
    cp = _round_up(cout, LANES)          # lane-dense channel padding
    k1 = 4 * cin
    ohp, owp = oh + 2, ow + 2

    wcomb, w2p = _prep_weights(params, cin, cout, cp)

    # space-to-depth(2) of the pad-1 input (polyphase): 1x HBM traffic, no im2col.
    xpad = jnp.pad(x, ((0, 0), (1, 1), (1, 1), (0, 0)))
    xp4 = xpad.reshape(n, oh + 1, 2, ow + 1, 2, cin)
    xp4 = jnp.transpose(xp4, (0, 1, 3, 2, 4, 5)).reshape(n, oh + 1, ow + 1, k1)
    xp4 = xp4.astype(jnp.bfloat16)

    cparams = pltpu.CompilerParams(dimension_semantics=("parallel",),
                                   vmem_limit_bytes=64 * 1024 * 1024)

    # -------- stage 1: conv1 + direct conv (shared input) + their BN sum/sumsq --------
    def stage1_kernel(xp_ref, w_ref, z1_ref, zd_ref, st_ref):
        acc = jnp.zeros((oh * ow, 2 * cp), jnp.float32)
        for a in range(2):
            for b in range(2):
                patch = xp_ref[0, a:a + oh, b:b + ow, :]              # (oh, ow, k1) bf16
                patch = patch.astype(jnp.float32).reshape(oh * ow, k1)
                acc = acc + jnp.dot(patch.astype(jnp.bfloat16), w_ref[2 * a + b],
                                    preferred_element_type=jnp.float32)
        z1_ref[0] = acc[:, :cp].reshape(oh, ow, cp)
        zd_ref[0] = acc[:, cp:].reshape(oh, ow, cp)
        st_ref[0, 0:1, :] = jnp.sum(acc, axis=0, keepdims=True)
        st_ref[0, 1:2, :] = jnp.sum(acc * acc, axis=0, keepdims=True)

    z1, zd, st1 = pl.pallas_call(
        stage1_kernel,
        grid=(n,),
        in_specs=[
            pl.BlockSpec((1, oh + 1, ow + 1, k1), lambda i: (i, 0, 0, 0)),
            pl.BlockSpec((4, k1, 2 * cp), lambda i: (0, 0, 0)),       # resident weights
        ],
        out_specs=[
            pl.BlockSpec((1, oh, ow, cp), lambda i: (i, 0, 0, 0)),
            pl.BlockSpec((1, oh, ow, cp), lambda i: (i, 0, 0, 0)),
            pl.BlockSpec((1, 2, 2 * cp), lambda i: (i, 0, 0)),
        ],
        out_shape=[
            jax.ShapeDtypeStruct((n, oh, ow, cp), jnp.float32),
            jax.ShapeDtypeStruct((n, oh, ow, cp), jnp.float32),
            jax.ShapeDtypeStruct((n, 2, 2 * cp), jnp.float32),
        ],
        compiler_params=cparams,
        cost_estimate=pl.CostEstimate(
            flops=2 * m * (4 * k1) * (2 * cp), transcendentals=0,
            bytes_accessed=(n * (oh + 1) * (ow + 1) * k1 * 2
                            + 2 * m * cp * 4 + 4 * k1 * 2 * cp * 2)),
    )(xp4, wcomb)

    # finalize BN1 / BN_direct statistics (tiny XLA math on (2, cp) vectors)
    st1 = jnp.sum(st1, axis=0)                                        # (2, 2*cp)
    count = jnp.float32(m)
    bn1 = _bn_scale_shift(st1[0, :cp], st1[1, :cp], count,
                          params['g1'], params['b1'], cout, cp)
    bnd = _bn_scale_shift(st1[0, cp:], st1[1, cp:], count,
                          params['g3'], params['b3'], cout, cp)

    # -------- stage 2: BN1+LReLU fused with in-kernel 3x3 conv2 + BN2 sum/sumsq --------
    def stage2_kernel(z1_ref, bn1_ref, w2_ref, z2_ref, st_ref, y_scr):
        bn = bn1_ref[...]
        scale = bn[0:1, :].reshape(1, 1, cp)
        shift = bn[1:2, :].reshape(1, 1, cp)
        y = z1_ref[0] * scale + shift
        y = jnp.where(y > 0, y, ALPHA * y)
        # zero-halo'ed activation lives only in VMEM; conv2 never re-reads HBM.
        y_scr[...] = jnp.zeros((ohp, owp, cp), jnp.float32)
        y_scr[1:1 + oh, 1:1 + ow, :] = y
        acc = jnp.zeros((oh * ow, cp), jnp.float32)
        for kh in range(3):
            for kw in range(3):
                patch = y_scr[kh:kh + oh, kw:kw + ow, :].reshape(oh * ow, cp)
                acc = acc + jnp.dot(patch.astype(jnp.bfloat16), w2_ref[3 * kh + kw],
                                    preferred_element_type=jnp.float32)
        z2_ref[0] = acc.reshape(oh, ow, cp)
        st_ref[0, 0:1, :] = jnp.sum(acc, axis=0, keepdims=True)
        st_ref[0, 1:2, :] = jnp.sum(acc * acc, axis=0, keepdims=True)

    z2, st2 = pl.pallas_call(
        stage2_kernel,
        grid=(n,),
        in_specs=[
            pl.BlockSpec((1, oh, ow, cp), lambda i: (i, 0, 0, 0)),
            pl.BlockSpec((2, cp), lambda i: (0, 0)),                  # folded BN1 params
            pl.BlockSpec((9, cp, cp), lambda i: (0, 0, 0)),           # resident conv2 weights
        ],
        out_specs=[
            pl.BlockSpec((1, oh, ow, cp), lambda i: (i, 0, 0, 0)),
            pl.BlockSpec((1, 2, cp), lambda i: (i, 0, 0)),
        ],
        out_shape=[
            jax.ShapeDtypeStruct((n, oh, ow, cp), jnp.float32),
            jax.ShapeDtypeStruct((n, 2, cp), jnp.float32),
        ],
        scratch_shapes=[pltpu.VMEM((ohp, owp, cp), jnp.float32)],
        compiler_params=cparams,
        cost_estimate=pl.CostEstimate(
            flops=2 * m * (9 * cp) * cp, transcendentals=0,
            bytes_accessed=2 * m * cp * 4 + 9 * cp * cp * 2),
    )(z1, bn1, w2p)

    st2 = jnp.sum(st2, axis=0)                                        # (2, cp)
    bn2 = _bn_scale_shift(st2[0], st2[1], count,
                          params['g2'], params['b2'], cout, cp)

    # -------- stage 3: BN2 / BN_direct + LeakyReLU + average, tiled over M rows --------
    tm = min(1024, _round_up(m, 8))
    mp = _round_up(m, tm)
    z2f = z2.reshape(m, cp)
    zdf = zd.reshape(m, cp)
    if mp != m:
        z2f = jnp.pad(z2f, ((0, mp - m), (0, 0)))
        zdf = jnp.pad(zdf, ((0, mp - m), (0, 0)))

    def finalize_kernel(z2_ref, zd_ref, bn2_ref, bnd_ref, o_ref):
        b2 = bn2_ref[...]
        bd = bnd_ref[...]
        y2 = z2_ref[...] * b2[0:1, :] + b2[1:2, :]
        y2 = jnp.where(y2 > 0, y2, ALPHA * y2)
        yd = zd_ref[...] * bd[0:1, :] + bd[1:2, :]
        yd = jnp.where(yd > 0, yd, ALPHA * yd)
        o_ref[...] = (y2 + yd) * 0.5

    outf = pl.pallas_call(
        finalize_kernel,
        grid=(mp // tm,),
        in_specs=[
            pl.BlockSpec((tm, cp), lambda i: (i, 0)),
            pl.BlockSpec((tm, cp), lambda i: (i, 0)),
            pl.BlockSpec((2, cp), lambda i: (0, 0)),
            pl.BlockSpec((2, cp), lambda i: (0, 0)),
        ],
        out_specs=pl.BlockSpec((tm, cp), lambda i: (i, 0)),
        out_shape=jax.ShapeDtypeStruct((mp, cp), jnp.float32),
        compiler_params=cparams,
        cost_estimate=pl.CostEstimate(
            flops=10 * mp * cp, transcendentals=0,
            bytes_accessed=3 * mp * cp * 4),
    )(z2f, zdf, bn2, bnd)

    out = outf[:m, :cout].reshape(n, oh, ow, cout)
    return jnp.transpose(out, (0, 3, 1, 2))                           # -> NCHW


# ------------------------- pure-JAX reference (check) -------------------------

def reference_forward(x_nchw, params):
    x = jnp.transpose(x_nchw, (0, 2, 3, 1)).astype(jnp.float32)

    def conv(inp, w_oihw, stride, pad):
        w_hwio = jnp.transpose(w_oihw, (2, 3, 1, 0))
        return lax.conv_general_dilated(
            inp, w_hwio, (stride, stride), ((pad, pad), (pad, pad)),
            dimension_numbers=('NHWC', 'HWIO', 'NHWC'))

    def bn_lrelu(z, g, b):
        mu = jnp.mean(z, axis=(0, 1, 2), keepdims=True)
        var = jnp.mean((z - mu) ** 2, axis=(0, 1, 2), keepdims=True)
        y = (z - mu) * lax.rsqrt(var + EPS) * g.reshape(1, 1, 1, -1) + b.reshape(1, 1, 1, -1)
        return jnp.where(y > 0, y, ALPHA * y)

    y = bn_lrelu(conv(x, params['w1'], 2, 1), params['g1'], params['b1'])
    y = bn_lrelu(conv(y, params['w2'], 1, 1), params['g2'], params['b2'])

    xp = lax.reduce_window(x, 0.0, lax.add, (1, 2, 2, 1), (1, 2, 2, 1), 'VALID') / 4.0
    d = bn_lrelu(conv(xp, params['wd'], 1, 0), params['g3'], params['b3'])

    return jnp.transpose((y + d) / 2.0, (0, 3, 1, 2))


# ------------------------------------ main ------------------------------------

def init_params(key, in_planes, out_planes):
    ks = jax.random.split(key, 9)
    w1 = _spectral_normalize(0.1 * jax.random.normal(ks[0], (out_planes, in_planes, 4, 4), jnp.float32))
    w2 = _spectral_normalize(0.1 * jax.random.normal(ks[1], (out_planes, out_planes, 3, 3), jnp.float32))
    wd = _spectral_normalize(0.1 * jax.random.normal(ks[2], (out_planes, in_planes, 1, 1), jnp.float32))
    mk = lambda k, scale, shift: shift + scale * jax.random.normal(k, (out_planes,), jnp.float32)
    return {
        'w1': w1, 'w2': w2, 'wd': wd,
        'g1': mk(ks[3], 0.1, 1.0), 'b1': mk(ks[4], 0.1, 0.0),
        'g2': mk(ks[5], 0.1, 1.0), 'b2': mk(ks[6], 0.1, 0.0),
        'g3': mk(ks[7], 0.1, 1.0), 'b3': mk(ks[8], 0.1, 0.0),
    }


if __name__ == "__main__":
    key = jax.random.PRNGKey(0)
    k_x, k_p = jax.random.split(key)

    in_planes, out_planes = 4, 8
    N, H, W = 2, 16, 16
    x = jax.random.normal(k_x, (N, in_planes, H, W), jnp.float32)   # NCHW, as in PyTorch
    params = init_params(k_p, in_planes, out_planes)

    out = jax.block_until_ready(down_block_forward(x, params))
    ref = jax.block_until_ready(reference_forward(x, params))

    assert out.shape == (N, out_planes, H // 2, W // 2), out.shape
    # bf16 MXU operands (vs. the all-f32 reference) -> loosened tolerance.
    np.testing.assert_allclose(np.asarray(out), np.asarray(ref), rtol=5e-2, atol=5e-2)

    print("KERNEL_OK")
</pallas_src>

<mosaic_0001>
module attributes {stable_mosaic.version = 11 : i64} {
  func.func @stage1_kernel(%arg0: i32, %arg1: memref<1x9x9x16xbf16, #tpu.memory_space<vmem>>, %arg2: memref<4x16x256xbf16, #tpu.memory_space<vmem>>, %arg3: memref<1x8x8x128xf32, #tpu.memory_space<vmem>>, %arg4: memref<1x8x8x128xf32, #tpu.memory_space<vmem>>, %arg5: memref<1x2x256xf32, #tpu.memory_space<vmem>>) attributes {dimension_semantics = [#tpu.dimension_semantics<parallel>], iteration_bounds = array<i64: 2>, scalar_prefetch = 0 : i64, scratch_operands = 0 : i64, tpu.core_type = #tpu.core_type<tc>, window_params = [{transform_indices = @transform_0, window_bounds = array<i64: 1, 9, 9, 16>}, {pipeline_mode = #tpu.pipeline_mode<synchronous>, transform_indices = @transform_1, window_bounds = array<i64: 4, 16, 256>}, {transform_indices = @transform_2, window_bounds = array<i64: 1, 8, 8, 128>}, {transform_indices = @transform_3, window_bounds = array<i64: 1, 8, 8, 128>}, {transform_indices = @transform_4, window_bounds = array<i64: 1, 2, 256>}]} {
    %cst = arith.constant 0.000000e+00 : f32
    %0 = vector.broadcast %cst : f32 to vector<64x256xf32>
    %c0 = arith.constant 0 : index
    %c0_0 = arith.constant 0 : index
    %c0_1 = arith.constant 0 : index
    %c0_2 = arith.constant 0 : index
    %1 = vector.load %arg1[%c0, %c0_0, %c0_1, %c0_2] : memref<1x9x9x16xbf16, #tpu.memory_space<vmem>>, vector<1x8x8x16xbf16>
    %2 = vector.shape_cast %1 : vector<1x8x8x16xbf16> to vector<8x8x16xbf16>
    %3 = arith.extf %2 : vector<8x8x16xbf16> to vector<8x8x16xf32>
    %4 = vector.shape_cast %3 : vector<8x8x16xf32> to vector<64x16xf32>
    %5 = arith.truncf %4 : vector<64x16xf32> to vector<64x16xbf16>
    %c0_3 = arith.constant 0 : index
    %c0_4 = arith.constant 0 : index
    %c0_5 = arith.constant 0 : index
    %6 = vector.load %arg2[%c0_3, %c0_4, %c0_5] : memref<4x16x256xbf16, #tpu.memory_space<vmem>>, vector<1x16x256xbf16>
    %7 = vector.shape_cast %6 : vector<1x16x256xbf16> to vector<16x256xbf16>
    %cst_6 = arith.constant dense<0.000000e+00> : vector<64x256xf32>
    %8 = tpu.matmul %5, %7, %cst_6 {dimension_numbers = #tpu.dot_dimension_numbers<[1], [0], [0], [1], [0, 0, 1, 1], [], []>} : vector<64x16xbf16>, vector<16x256xbf16>, vector<64x256xf32> -> vector<64x256xf32>
    %9 = arith.addf %0, %8 : vector<64x256xf32>
    %c0_7 = arith.constant 0 : index
    %c0_8 = arith.constant 0 : index
    %c1 = arith.constant 1 : index
    %c0_9 = arith.constant 0 : index
    %10 = vector.load %arg1[%c0_7, %c0_8, %c1, %c0_9] : memref<1x9x9x16xbf16, #tpu.memory_space<vmem>>, vector<1x8x8x16xbf16>
    %11 = vector.shape_cast %10 : vector<1x8x8x16xbf16> to vector<8x8x16xbf16>
    %12 = arith.extf %11 : vector<8x8x16xbf16> to vector<8x8x16xf32>
    %13 = vector.shape_cast %12 : vector<8x8x16xf32> to vector<64x16xf32>
    %14 = arith.truncf %13 : vector<64x16xf32> to vector<64x16xbf16>
    %c1_10 = arith.constant 1 : index
    %c0_11 = arith.constant 0 : index
    %c0_12 = arith.constant 0 : index
    %15 = vector.load %arg2[%c1_10, %c0_11, %c0_12] : memref<4x16x256xbf16, #tpu.memory_space<vmem>>, vector<1x16x256xbf16>
    %16 = vector.shape_cast %15 : vector<1x16x256xbf16> to vector<16x256xbf16>
    %cst_13 = arith.constant dense<0.000000e+00> : vector<64x256xf32>
    %17 = tpu.matmul %14, %16, %cst_13 {dimension_numbers = #tpu.dot_dimension_numbers<[1], [0], [0], [1], [0, 0, 1, 1], [], []>} : vector<64x16xbf16>, vector<16x256xbf16>, vector<64x256xf32> -> vector<64x256xf32>
    %18 = arith.addf %9, %17 : vector<64x256xf32>
    %c0_14 = arith.constant 0 : index
    %c1_15 = arith.constant 1 : index
    %c0_16 = arith.constant 0 : index
    %c0_17 = arith.constant 0 : index
    %19 = vector.load %arg1[%c0_14, %c1_15, %c0_16, %c0_17] : memref<1x9x9x16xbf16, #tpu.memory_space<vmem>>, vector<1x8x8x16xbf16>
    %20 = vector.shape_cast %19 : vector<1x8x8x16xbf16> to vector<8x8x16xbf16>
    %21 = arith.extf %20 : vector<8x8x16xbf16> to vector<8x8x16xf32>
    %22 = vector.shape_cast %21 : vector<8x8x16xf32> to vector<64x16xf32>
    %23 = arith.truncf %22 : vector<64x16xf32> to vector<64x16xbf16>
    %c2 = arith.constant 2 : index
    %c0_18 = arith.constant 0 : index
    %c0_19 = arith.constant 0 : index
    %24 = vector.load %arg2[%c2, %c0_18, %c0_19] : memref<4x16x256xbf16, #tpu.memory_space<vmem>>, vector<1x16x256xbf16>
    %25 = vector.shape_cast %24 : vector<1x16x256xbf16> to vector<16x256xbf16>
    %cst_20 = arith.constant dense<0.000000e+00> : vector<64x256xf32>
    %26 = tpu.matmul %23, %25, %cst_20 {dimension_numbers = #tpu.dot_dimension_numbers<[1], [0], [0], [1], [0, 0, 1, 1], [], []>} : vector<64x16xbf16>, vector<16x256xbf16>, vector<64x256xf32> -> vector<64x256xf32>
    %27 = arith.addf %18, %26 : vector<64x256xf32>
    %c0_21 = arith.constant 0 : index
    %c1_22 = arith.constant 1 : index
    %c1_23 = arith.constant 1 : index
    %c0_24 = arith.constant 0 : index
    %28 = vector.load %arg1[%c0_21, %c1_22, %c1_23, %c0_24] : memref<1x9x9x16xbf16, #tpu.memory_space<vmem>>, vector<1x8x8x16xbf16>
    %29 = vector.shape_cast %28 : vector<1x8x8x16xbf16> to vector<8x8x16xbf16>
    %30 = arith.extf %29 : vector<8x8x16xbf16> to vector<8x8x16xf32>
    %31 = vector.shape_cast %30 : vector<8x8x16xf32> to vector<64x16xf32>
    %32 = arith.truncf %31 : vector<64x16xf32> to vector<64x16xbf16>
    %c3 = arith.constant 3 : index
    %c0_25 = arith.constant 0 : index
    %c0_26 = arith.constant 0 : index
    %33 = vector.load %arg2[%c3, %c0_25, %c0_26] : memref<4x16x256xbf16, #tpu.memory_space<vmem>>, vector<1x16x256xbf16>
    %34 = vector.shape_cast %33 : vector<1x16x256xbf16> to vector<16x256xbf16>
    %cst_27 = arith.constant dense<0.000000e+00> : vector<64x256xf32>
    %35 = tpu.matmul %32, %34, %cst_27 {dimension_numbers = #tpu.dot_dimension_numbers<[1], [0], [0], [1], [0, 0, 1, 1], [], []>} : vector<64x16xbf16>, vector<16x256xbf16>, vector<64x256xf32> -> vector<64x256xf32>
    %36 = arith.addf %27, %35 : vector<64x256xf32>
    %37 = vector.extract_strided_slice %36 {offsets = [0, 0], sizes = [64, 128], strides = [1, 1]} : vector<64x256xf32> to vector<64x128xf32>
    %38 = vector.shape_cast %37 : vector<64x128xf32> to vector<8x8x128xf32>
    %c0_28 = arith.constant 0 : index
    %c0_29 = arith.constant 0 : index
    %c0_30 = arith.constant 0 : index
    %c0_31 = arith.constant 0 : index
    %39 = vector.load %arg3[%c0_28, %c0_29, %c0_30, %c0_31] : memref<1x8x8x128xf32, #tpu.memory_space<vmem>>, vector<1x8x8x128xf32>
    %40 = vector.shape_cast %39 : vector<1x8x8x128xf32> to vector<8x8x128xf32>
    %41 = vector.shape_cast %38 : vector<8x8x128xf32> to vector<1x8x8x128xf32>
    tpu.vector_store %arg3[%c0_28, %c0_29, %c0_30, %c0_31], %41 {strides = array<i32>} : memref<1x8x8x128xf32, #tpu.memory_space<vmem>>, vector<1x8x8x128xf32>,
    %42 = vector.extract_strided_slice %36 {offsets = [0, 128], sizes = [64, 128], strides = [1, 1]} : vector<64x256xf32> to vector<64x128xf32>
    %43 = vector.shape_cast %42 : vector<64x128xf32> to vector<8x8x128xf32>
    %c0_32 = arith.constant 0 : index
    %c0_33 = arith.constant 0 : index
    %c0_34 = arith.constant 0 : index
    %c0_35 = arith.constant 0 : index
    %44 = vector.load %arg4[%c0_32, %c0_33, %c0_34, %c0_35] : memref<1x8x8x128xf32, #tpu.memory_space<vmem>>, vector<1x8x8x128xf32>
    %45 = vector.shape_cast %44 : vector<1x8x8x128xf32> to vector<8x8x128xf32>
    %46 = vector.shape_cast %43 : vector<8x8x128xf32> to vector<1x8x8x128xf32>
    tpu.vector_store %arg4[%c0_32, %c0_33, %c0_34, %c0_35], %46 {strides = array<i32>} : memref<1x8x8x128xf32, #tpu.memory_space<vmem>>, vector<1x8x8x128xf32>,
    %cst_36 = arith.constant dense<0.000000e+00> : vector<256xf32>
    %47 = vector.multi_reduction <add>, %36, %cst_36 [0] : vector<64x256xf32> to vector<256xf32>
    %48 = vector.shape_cast %47 : vector<256xf32> to vector<1x256xf32>
    %c0_37 = arith.constant 0 : index
    %c0_38 = arith.constant 0 : index
    %c0_39 = arith.constant 0 : index
    %49 = vector.load %arg5[%c0_37, %c0_38, %c0_39] : memref<1x2x256xf32, #tpu.memory_space<vmem>>, vector<1x1x256xf32>
    %50 = vector.shape_cast %49 : vector<1x1x256xf32> to vector<1x256xf32>
    %51 = vector.shape_cast %48 : vector<1x256xf32> to vector<1x1x256xf32>
    tpu.vector_store %arg5[%c0_37, %c0_38, %c0_39], %51 {strides = array<i32>} : memref<1x2x256xf32, #tpu.memory_space<vmem>>, vector<1x1x256xf32>,
    %52 = arith.mulf %36, %36 : vector<64x256xf32>
    %cst_40 = arith.constant dense<0.000000e+00> : vector<256xf32>
    %53 = vector.multi_reduction <add>, %52, %cst_40 [0] : vector<64x256xf32> to vector<256xf32>
    %54 = vector.shape_cast %53 : vector<256xf32> to vector<1x256xf32>
    %c0_41 = arith.constant 0 : index
    %c1_42 = arith.constant 1 : index
    %c0_43 = arith.constant 0 : index
    %55 = vector.load %arg5[%c0_41, %c1_42, %c0_43] : memref<1x2x256xf32, #tpu.memory_space<vmem>>, vector<1x1x256xf32>
    %56 = vector.shape_cast %55 : vector<1x1x256xf32> to vector<1x256xf32>
    %57 = vector.shape_cast %54 : vector<1x256xf32> to vector<1x1x256xf32>
    tpu.vector_store %arg5[%c0_41, %c1_42, %c0_43], %57 {strides = array<i32>} : memref<1x2x256xf32, #tpu.memory_space<vmem>>, vector<1x1x256xf32>,
    return
  }
  func.func @transform_0(%arg0: i32) -> (i32, i32, i32, i32) {
    %c0_i32 = arith.constant 0 : i32
    %c0_i32_0 = arith.constant 0 : i32
    %c0_i32_1 = arith.constant 0 : i32
    %c0_i32_2 = arith.constant 0 : i32
    return %arg0, %c0_i32, %c0_i32_0, %c0_i32_1 : i32, i32, i32, i32
  }
  func.func @transform_1(%arg0: i32) -> (i32, i32, i32) {
    %c0_i32 = arith.constant 0 : i32
    %c0_i32_0 = arith.constant 0 : i32
    %c0_i32_1 = arith.constant 0 : i32
    %c0_i32_2 = arith.constant 0 : i32
    return %c0_i32, %c0_i32_0, %c0_i32_1 : i32, i32, i32
  }
  func.func @transform_2(%arg0: i32) -> (i32, i32, i32, i32) {
    %c0_i32 = arith.constant 0 : i32
    %c0_i32_0 = arith.constant 0 : i32
    %c0_i32_1 = arith.constant 0 : i32
    %c0_i32_2 = arith.constant 0 : i32
    return %arg0, %c0_i32, %c0_i32_0, %c0_i32_1 : i32, i32, i32, i32
  }
  func.func @transform_3(%arg0: i32) -> (i32, i32, i32, i32) {
    %c0_i32 = arith.constant 0 : i32
    %c0_i32_0 = arith.constant 0 : i32
    %c0_i32_1 = arith.constant 0 : i32
    %c0_i32_2 = arith.constant 0 : i32
    return %arg0, %c0_i32, %c0_i32_0, %c0_i32_1 : i32, i32, i32, i32
  }
  func.func @transform_4(%arg0: i32) -> (i32, i32, i32) {
    %c0_i32 = arith.constant 0 : i32
    %c0_i32_0 = arith.constant 0 : i32
    %c0_i32_1 = arith.constant 0 : i32
    return %arg0, %c0_i32, %c0_i32_0 : i32, i32, i32
  }
}

module attributes {stable_mosaic.version = 11 : i64} {
  func.func @stage2_kernel(%arg0: i32, %arg1: memref<1x8x8x128xf32, #tpu.memory_space<vmem>>, %arg2: memref<2x128xf32, #tpu.memory_space<vmem>>, %arg3: memref<9x128x128xbf16, #tpu.memory_space<vmem>>, %arg4: memref<1x8x8x128xf32, #tpu.memory_space<vmem>>, %arg5: memref<1x2x128xf32, #tpu.memory_space<vmem>>, %arg6: memref<10x10x128xf32, #tpu.memory_space<vmem>>) attributes {dimension_semantics = [#tpu.dimension_semantics<parallel>], iteration_bounds = array<i64: 2>, scalar_prefetch = 0 : i64, scratch_operands = 1 : i64, tpu.core_type = #tpu.core_type<tc>, window_params = [{transform_indices = @transform_0, window_bounds = array<i64: 1, 8, 8, 128>}, {pipeline_mode = #tpu.pipeline_mode<synchronous>, transform_indices = @transform_1, window_bounds = array<i64: 2, 128>}, {pipeline_mode = #tpu.pipeline_mode<synchronous>, transform_indices = @transform_2, window_bounds = array<i64: 9, 128, 128>}, {transform_indices = @transform_3, window_bounds = array<i64: 1, 8, 8, 128>}, {transform_indices = @transform_4, window_bounds = array<i64: 1, 2, 128>}]} {
    %c0 = arith.constant 0 : index
    %c0_0 = arith.constant 0 : index
    %0 = vector.load %arg2[%c0, %c0_0] : memref<2x128xf32, #tpu.memory_space<vmem>>, vector<2x128xf32>
    %1 = vector.extract_strided_slice %0 {offsets = [0, 0], sizes = [1, 128], strides = [1, 1]} : vector<2x128xf32> to vector<1x128xf32>
    %2 = vector.shape_cast %1 : vector<1x128xf32> to vector<1x1x128xf32>
    %3 = vector.extract_strided_slice %0 {offsets = [1, 0], sizes = [1, 128], strides = [1, 1]} : vector<2x128xf32> to vector<1x128xf32>
    %4 = vector.shape_cast %3 : vector<1x128xf32> to vector<1x1x128xf32>
    %c0_1 = arith.constant 0 : index
    %c0_2 = arith.constant 0 : index
    %c0_3 = arith.constant 0 : index
    %c0_4 = arith.constant 0 : index
    %5 = vector.load %arg1[%c0_1, %c0_2, %c0_3, %c0_4] : memref<1x8x8x128xf32, #tpu.memory_space<vmem>>, vector<1x8x8x128xf32>
    %6 = vector.shape_cast %5 : vector<1x8x8x128xf32> to vector<8x8x128xf32>
    %7 = vector.broadcast %2 : vector<1x1x128xf32> to vector<8x8x128xf32>
    %8 = arith.mulf %6, %7 : vector<8x8x128xf32>
    %9 = vector.broadcast %4 : vector<1x1x128xf32> to vector<8x8x128xf32>
    %10 = arith.addf %8, %9 : vector<8x8x128xf32>
    %cst = arith.constant 0.000000e+00 : f32
    %11 = vector.broadcast %cst : f32 to vector<8x8x128xf32>
    %12 = arith.cmpf ogt, %10, %11 : vector<8x8x128xf32>
    %cst_5 = arith.constant 2.000000e-01 : f32
    %13 = vector.broadcast %cst_5 : f32 to vector<8x8x128xf32>
    %14 = arith.mulf %13, %10 : vector<8x8x128xf32>
    %15 = arith.select %12, %10, %14 : vector<8x8x128xi1>, vector<8x8x128xf32>
    %cst_6 = arith.constant 0.000000e+00 : f32
    %16 = vector.broadcast %cst_6 : f32 to vector<10x10x128xf32>
    %c0_7 = arith.constant 0 : index
    %c0_8 = arith.constant 0 : index
    %c0_9 = arith.constant 0 : index
    %17 = vector.load %arg6[%c0_7, %c0_8, %c0_9] : memref<10x10x128xf32, #tpu.memory_space<vmem>>, vector<10x10x128xf32>
    tpu.vector_store %arg6[%c0_7, %c0_8, %c0_9], %16 {strides = array<i32>} : memref<10x10x128xf32, #tpu.memory_space<vmem>>, vector<10x10x128xf32>,
    %c1 = arith.constant 1 : index
    %c1_10 = arith.constant 1 : index
    %c0_11 = arith.constant 0 : index
    %18 = vector.load %arg6[%c1, %c1_10, %c0_11] : memref<10x10x128xf32, #tpu.memory_space<vmem>>, vector<8x8x128xf32>
    tpu.vector_store %arg6[%c1, %c1_10, %c0_11], %15 {strides = array<i32>} : memref<10x10x128xf32, #tpu.memory_space<vmem>>, vector<8x8x128xf32>,
    %cst_12 = arith.constant 0.000000e+00 : f32
    %19 = vector.broadcast %cst_12 : f32 to vector<64x128xf32>
    %c0_13 = arith.constant 0 : index
    %c0_14 = arith.constant 0 : index
    %c0_15 = arith.constant 0 : index
    %20 = vector.load %arg6[%c0_13, %c0_14, %c0_15] : memref<10x10x128xf32, #tpu.memory_space<vmem>>, vector<8x8x128xf32>
    %21 = vector.shape_cast %20 : vector<8x8x128xf32> to vector<64x128xf32>
    %22 = arith.truncf %21 : vector<64x128xf32> to vector<64x128xbf16>
    %c0_16 = arith.constant 0 : index
    %c0_17 = arith.constant 0 : index
    %c0_18 = arith.constant 0 : index
    %23 = vector.load %arg3[%c0_16, %c0_17, %c0_18] : memref<9x128x128xbf16, #tpu.memory_space<vmem>>, vector<1x128x128xbf16>
    %24 = vector.shape_cast %23 : vector<1x128x128xbf16> to vector<128x128xbf16>
    %cst_19 = arith.constant dense<0.000000e+00> : vector<64x128xf32>
    %25 = tpu.matmul %22, %24, %cst_19 {dimension_numbers = #tpu.dot_dimension_numbers<[1], [0], [0], [1], [0, 0, 1, 1], [], []>} : vector<64x128xbf16>, vector<128x128xbf16>, vector<64x128xf32> -> vector<64x128xf32>
    %26 = arith.addf %19, %25 : vector<64x128xf32>
    %c0_20 = arith.constant 0 : index
    %c1_21 = arith.constant 1 : index
    %c0_22 = arith.constant 0 : index
    %27 = vector.load %arg6[%c0_20, %c1_21, %c0_22] : memref<10x10x128xf32, #tpu.memory_space<vmem>>, vector<8x8x128xf32>
    %28 = vector.shape_cast %27 : vector<8x8x128xf32> to vector<64x128xf32>
    %29 = arith.truncf %28 : vector<64x128xf32> to vector<64x128xbf16>
    %c1_23 = arith.constant 1 : index
    %c0_24 = arith.constant 0 : index
    %c0_25 = arith.constant 0 : index
    %30 = vector.load %arg3[%c1_23, %c0_24, %c0_25] : memref<9x128x128xbf16, #tpu.memory_space<vmem>>, vector<1x128x128xbf16>
    %31 = vector.shape_cast %30 : vector<1x128x128xbf16> to vector<128x128xbf16>
    %cst_26 = arith.constant dense<0.000000e+00> : vector<64x128xf32>
    %32 = tpu.matmul %29, %31, %cst_26 {dimension_numbers = #tpu.dot_dimension_numbers<[1], [0], [0], [1], [0, 0, 1, 1], [], []>} : vector<64x128xbf16>, vector<128x128xbf16>, vector<64x128xf32> -> vector<64x128xf32>
    %33 = arith.addf %26, %32 : vector<64x128xf32>
    %c0_27 = arith.constant 0 : index
    %c2 = arith.constant 2 : index
    %c0_28 = arith.constant 0 : index
    %34 = vector.load %arg6[%c0_27, %c2, %c0_28] : memref<10x10x128xf32, #tpu.memory_space<vmem>>, vector<8x8x128xf32>
    %35 = vector.shape_cast %34 : vector<8x8x128xf32> to vector<64x128xf32>
    %36 = arith.truncf %35 : vector<64x128xf32> to vector<64x128xbf16>
    %c2_29 = arith.constant 2 : index
    %c0_30 = arith.constant 0 : index
    %c0_31 = arith.constant 0 : index
    %37 = vector.load %arg3[%c2_29, %c0_30, %c0_31] : memref<9x128x128xbf16, #tpu.memory_space<vmem>>, vector<1x128x128xbf16>
    %38 = vector.shape_cast %37 : vector<1x128x128xbf16> to vector<128x128xbf16>
    %cst_32 = arith.constant dense<0.000000e+00> : vector<64x128xf32>
    %39 = tpu.matmul %36, %38, %cst_32 {dimension_numbers = #tpu.dot_dimension_numbers<[1], [0], [0], [1], [0, 0, 1, 1], [], []>} : vector<64x128xbf16>, vector<128x128xbf16>, vector<64x128xf32> -> vector<64x128xf32>
    %40 = arith.addf %33, %39 : vector<64x128xf32>
    %c1_33 = arith.constant 1 : index
    %c0_34 = arith.constant 0 : index
    %c0_35 = arith.constant 0 : index
    %41 = vector.load %arg6[%c1_33, %c0_34, %c0_35] : memref<10x10x128xf32, #tpu.memory_space<vmem>>, vector<8x8x128xf32>
    %42 = vector.shape_cast %41 : vector<8x8x128xf32> to vector<64x128xf32>
    %43 = arith.truncf %42 : vector<64x128xf32> to vector<64x128xbf16>
    %c3 = arith.constant 3 : index
    %c0_36 = arith.constant 0 : index
    %c0_37 = arith.constant 0 : index
    %44 = vector.load %arg3[%c3, %c0_36, %c0_37] : memref<9x128x128xbf16, #tpu.memory_space<vmem>>, vector<1x128x128xbf16>
    %45 = vector.shape_cast %44 : vector<1x128x128xbf16> to vector<128x128xbf16>
    %cst_38 = arith.constant dense<0.000000e+00> : vector<64x128xf32>
    %46 = tpu.matmul %43, %45, %cst_38 {dimension_numbers = #tpu.dot_dimension_numbers<[1], [0], [0], [1], [0, 0, 1, 1], [], []>} : vector<64x128xbf16>, vector<128x128xbf16>, vector<64x128xf32> -> vector<64x128xf32>
    %47 = arith.addf %40, %46 : vector<64x128xf32>
    %c1_39 = arith.constant 1 : index
    %c1_40 = arith.constant 1 : index
    %c0_41 = arith.constant 0 : index
    %48 = vector.load %arg6[%c1_39, %c1_40, %c0_41] : memref<10x10x128xf32, #tpu.memory_space<vmem>>, vector<8x8x128xf32>
    %49 = vector.shape_cast %48 : vector<8x8x128xf32> to vector<64x128xf32>
    %50 = arith.truncf %49 : vector<64x128xf32> to vector<64x128xbf16>
    %c4 = arith.constant 4 : index
    %c0_42 = arith.constant 0 : index
    %c0_43 = arith.constant 0 : index
    %51 = vector.load %arg3[%c4, %c0_42, %c0_43] : memref<9x128x128xbf16, #tpu.memory_space<vmem>>, vector<1x128x128xbf16>
    %52 = vector.shape_cast %51 : vector<1x128x128xbf16> to vector<128x128xbf16>
    %cst_44 = arith.constant dense<0.000000e+00> : vector<64x128xf32>
    %53 = tpu.matmul %50, %52, %cst_44 {dimension_numbers = #tpu.dot_dimension_numbers<[1], [0], [0], [1], [0, 0, 1, 1], [], []>} : vector<64x128xbf16>, vector<128x128xbf16>, vector<64x128xf32> -> vector<64x128xf32>
    %54 = arith.addf %47, %53 : vector<64x128xf32>
    %c1_45 = arith.constant 1 : index
    %c2_46 = arith.constant 2 : index
    %c0_47 = arith.constant 0 : index
    %55 = vector.load %arg6[%c1_45, %c2_46, %c0_47] : memref<10x10x128xf32, #tpu.memory_space<vmem>>, vector<8x8x128xf32>
    %56 = vector.shape_cast %55 : vector<8x8x128xf32> to vector<64x128xf32>
    %57 = arith.truncf %56 : vector<64x128xf32> to vector<64x128xbf16>
    %c5 = arith.constant 5 : index
    %c0_48 = arith.constant 0 : index
    %c0_49 = arith.constant 0 : index
    %58 = vector.load %arg3[%c5, %c0_48, %c0_49] : memref<9x128x128xbf16, #tpu.memory_space<vmem>>, vector<1x128x128xbf16>
    %59 = vector.shape_cast %58 : vector<1x128x128xbf16> to vector<128x128xbf16>
    %cst_50 = arith.constant dense<0.000000e+00> : vector<64x128xf32>
    %60 = tpu.matmul %57, %59, %cst_50 {dimension_numbers = #tpu.dot_dimension_numbers<[1], [0], [0], [1], [0, 0, 1, 1], [], []>} : vector<64x128xbf16>, vector<128x128xbf16>, vector<64x128xf32> -> vector<64x128xf32>
    %61 = arith.addf %54, %60 : vector<64x128xf32>
    %c2_51 = arith.constant 2 : index
    %c0_52 = arith.constant 0 : index
    %c0_53 = arith.constant 0 : index
    %62 = vector.load %arg6[%c2_51, %c0_52, %c0_53] : memref<10x10x128xf32, #tpu.memory_space<vmem>>, vector<8x8x128xf32>
    %63 = vector.shape_cast %62 : vector<8x8x128xf32> to vector<64x128xf32>
    %64 = arith.truncf %63 : vector<64x128xf32> to vector<64x128xbf16>
    %c6 = arith.constant 6 : index
    %c0_54 = arith.constant 0 : index
    %c0_55 = arith.constant 0 : index
    %65 = vector.load %arg3[%c6, %c0_54, %c0_55] : memref<9x128x128xbf16, #tpu.memory_space<vmem>>, vector<1x128x128xbf16>
    %66 = vector.shape_cast %65 : vector<1x128x128xbf16> to vector<128x128xbf16>
    %cst_56 = arith.constant dense<0.000000e+00> : vector<64x128xf32>
    %67 = tpu.matmul %64, %66, %cst_56 {dimension_numbers = #tpu.dot_dimension_numbers<[1], [0], [0], [1], [0, 0, 1, 1], [], []>} : vector<64x128xbf16>, vector<128x128xbf16>, vector<64x128xf32> -> vector<64x128xf32>
    %68 = arith.addf %61, %67 : vector<64x128xf32>
    %c2_57 = arith.constant 2 : index
    %c1_58 = arith.constant 1 : index
    %c0_59 = arith.constant 0 : index
    %69 = vector.load %arg6[%c2_57, %c1_58, %c0_59] : memref<10x10x128xf32, #tpu.memory_space<vmem>>, vector<8x8x128xf32>
    %70 = vector.shape_cast %69 : vector<8x8x128xf32> to vector<64x128xf32>
    %71 = arith.truncf %70 : vector<64x128xf32> to vector<64x128xbf16>
    %c7 = arith.constant 7 : index
    %c0_60 = arith.constant 0 : index
    %c0_61 = arith.constant 0 : index
    %72 = vector.load %arg3[%c7, %c0_60, %c0_61] : memref<9x128x128xbf16, #tpu.memory_space<vmem>>, vector<1x128x128xbf16>
    %73 = vector.shape_cast %72 : vector<1x128x128xbf16> to vector<128x128xbf16>
    %cst_62 = arith.constant dense<0.000000e+00> : vector<64x128xf32>
    %74 = tpu.matmul %71, %73, %cst_62 {dimension_numbers = #tpu.dot_dimension_numbers<[1], [0], [0], [1], [0, 0, 1, 1], [], []>} : vector<64x128xbf16>, vector<128x128xbf16>, vector<64x128xf32> -> vector<64x128xf32>
    %75 = arith.addf %68, %74 : vector<64x128xf32>
    %c2_63 = arith.constant 2 : index
    %c2_64 = arith.constant 2 : index
    %c0_65 = arith.constant 0 : index
    %76 = vector.load %arg6[%c2_63, %c2_64, %c0_65] : memref<10x10x128xf32, #tpu.memory_space<vmem>>, vector<8x8x128xf32>
    %77 = vector.shape_cast %76 : vector<8x8x128xf32> to vector<64x128xf32>
    %78 = arith.truncf %77 : vector<64x128xf32> to vector<64x128xbf16>
    %c8 = arith.constant 8 : index
    %c0_66 = arith.constant 0 : index
    %c0_67 = arith.constant 0 : index
    %79 = vector.load %arg3[%c8, %c0_66, %c0_67] : memref<9x128x128xbf16, #tpu.memory_space<vmem>>, vector<1x128x128xbf16>
    %80 = vector.shape_cast %79 : vector<1x128x128xbf16> to vector<128x128xbf16>
    %cst_68 = arith.constant dense<0.000000e+00> : vector<64x128xf32>
    %81 = tpu.matmul %78, %80, %cst_68 {dimension_numbers = #tpu.dot_dimension_numbers<[1], [0], [0], [1], [0, 0, 1, 1], [], []>} : vector<64x128xbf16>, vector<128x128xbf16>, vector<64x128xf32> -> vector<64x128xf32>
    %82 = arith.addf %75, %81 : vector<64x128xf32>
    %83 = vector.shape_cast %82 : vector<64x128xf32> to vector<8x8x128xf32>
    %c0_69 = arith.constant 0 : index
    %c0_70 = arith.constant 0 : index
    %c0_71 = arith.constant 0 : index
    %c0_72 = arith.constant 0 : index
    %84 = vector.load %arg4[%c0_69, %c0_70, %c0_71, %c0_72] : memref<1x8x8x128xf32, #tpu.memory_space<vmem>>, vector<1x8x8x128xf32>
    %85 = vector.shape_cast %84 : vector<1x8x8x128xf32> to vector<8x8x128xf32>
    %86 = vector.shape_cast %83 : vector<8x8x128xf32> to vector<1x8x8x128xf32>
    tpu.vector_store %arg4[%c0_69, %c0_70, %c0_71, %c0_72], %86 {strides = array<i32>} : memref<1x8x8x128xf32, #tpu.memory_space<vmem>>, vector<1x8x8x128xf32>,
    %cst_73 = arith.constant dense<0.000000e+00> : vector<128xf32>
    %87 = vector.multi_reduction <add>, %82, %cst_73 [0] : vector<64x128xf32> to vector<128xf32>
    %88 = vector.shape_cast %87 : vector<128xf32> to vector<1x128xf32>
    %c0_74 = arith.constant 0 : index
    %c0_75 = arith.constant 0 : index
    %c0_76 = arith.constant 0 : index
    %89 = vector.load %arg5[%c0_74, %c0_75, %c0_76] : memref<1x2x128xf32, #tpu.memory_space<vmem>>, vector<1x1x128xf32>
    %90 = vector.shape_cast %89 : vector<1x1x128xf32> to vector<1x128xf32>
    %91 = vector.shape_cast %88 : vector<1x128xf32> to vector<1x1x128xf32>
    tpu.vector_store %arg5[%c0_74, %c0_75, %c0_76], %91 {strides = array<i32>} : memref<1x2x128xf32, #tpu.memory_space<vmem>>, vector<1x1x128xf32>,
    %92 = arith.mulf %82, %82 : vector<64x128xf32>
    %cst_77 = arith.constant dense<0.000000e+00> : vector<128xf32>
    %93 = vector.multi_reduction <add>, %92, %cst_77 [0] : vector<64x128xf32> to vector<128xf32>
    %94 = vector.shape_cast %93 : vector<128xf32> to vector<1x128xf32>
    %c0_78 = arith.constant 0 : index
    %c1_79 = arith.constant 1 : index
    %c0_80 = arith.constant 0 : index
    %95 = vector.load %arg5[%c0_78, %c1_79, %c0_80] : memref<1x2x128xf32, #tpu.memory_space<vmem>>, vector<1x1x128xf32>
    %96 = vector.shape_cast %95 : vector<1x1x128xf32> to vector<1x128xf32>
    %97 = vector.shape_cast %94 : vector<1x128xf32> to vector<1x1x128xf32>
    tpu.vector_store %arg5[%c0_78, %c1_79, %c0_80], %97 {strides = array<i32>} : memref<1x2x128xf32, #tpu.memory_space<vmem>>, vector<1x1x128xf32>,
    return
  }
  func.func @transform_0(%arg0: i32) -> (i32, i32, i32, i32) {
    %c0_i32 = arith.constant 0 : i32
    %c0_i32_0 = arith.constant 0 : i32
    %c0_i32_1 = arith.constant 0 : i32
    %c0_i32_2 = arith.constant 0 : i32
    return %arg0, %c0_i32, %c0_i32_0, %c0_i32_1 : i32, i32, i32, i32
  }
  func.func @transform_1(%arg0: i32) -> (i32, i32) {
    %c0_i32 = arith.constant 0 : i32
    %c0_i32_0 = arith.constant 0 : i32
    %c0_i32_1 = arith.constant 0 : i32
    return %c0_i32, %c0_i32_0 : i32, i32
  }
  func.func @transform_2(%arg0: i32) -> (i32, i32, i32) {
    %c0_i32 = arith.constant 0 : i32
    %c0_i32_0 = arith.constant 0 : i32
    %c0_i32_1 = arith.constant 0 : i32
    %c0_i32_2 = arith.constant 0 : i32
    return %c0_i32, %c0_i32_0, %c0_i32_1 : i32, i32, i32
  }
  func.func @transform_3(%arg0: i32) -> (i32, i32, i32, i32) {
    %c0_i32 = arith.constant 0 : i32
    %c0_i32_0 = arith.constant 0 : i32
    %c0_i32_1 = arith.constant 0 : i32
    %c0_i32_2 = arith.constant 0 : i32
    return %arg0, %c0_i32, %c0_i32_0, %c0_i32_1 : i32, i32, i32, i32
  }
  func.func @transform_4(%arg0: i32) -> (i32, i32, i32) {
    %c0_i32 = arith.constant 0 : i32
    %c0_i32_0 = arith.constant 0 : i32
    %c0_i32_1 = arith.constant 0 : i32
    return %arg0, %c0_i32, %c0_i32_0 : i32, i32, i32
  }
}

module attributes {stable_mosaic.version = 11 : i64} {
  func.func @finalize_kernel(%arg0: i32, %arg1: memref<128x128xf32, #tpu.memory_space<vmem>>, %arg2: memref<128x128xf32, #tpu.memory_space<vmem>>, %arg3: memref<2x128xf32, #tpu.memory_space<vmem>>, %arg4: memref<2x128xf32, #tpu.memory_space<vmem>>, %arg5: memref<128x128xf32, #tpu.memory_space<vmem>>) attributes {dimension_semantics = [#tpu.dimension_semantics<parallel>], iteration_bounds = array<i64: 1>, scalar_prefetch = 0 : i64, scratch_operands = 0 : i64, tpu.core_type = #tpu.core_type<tc>, window_params = [{transform_indices = @transform_0, window_bounds = array<i64: 128, 128>}, {transform_indices = @transform_1, window_bounds = array<i64: 128, 128>}, {pipeline_mode = #tpu.pipeline_mode<synchronous>, transform_indices = @transform_2, window_bounds = array<i64: 2, 128>}, {pipeline_mode = #tpu.pipeline_mode<synchronous>, transform_indices = @transform_3, window_bounds = array<i64: 2, 128>}, {transform_indices = @transform_4, window_bounds = array<i64: 128, 128>}]} {
    %c0 = arith.constant 0 : index
    %c0_0 = arith.constant 0 : index
    %0 = vector.load %arg3[%c0, %c0_0] : memref<2x128xf32, #tpu.memory_space<vmem>>, vector<2x128xf32>
    %c0_1 = arith.constant 0 : index
    %c0_2 = arith.constant 0 : index
    %1 = vector.load %arg4[%c0_1, %c0_2] : memref<2x128xf32, #tpu.memory_space<vmem>>, vector<2x128xf32>
    %c0_3 = arith.constant 0 : index
    %c0_4 = arith.constant 0 : index
    %2 = vector.load %arg1[%c0_3, %c0_4] : memref<128x128xf32, #tpu.memory_space<vmem>>, vector<128x128xf32>
    %3 = vector.extract_strided_slice %0 {offsets = [0, 0], sizes = [1, 128], strides = [1, 1]} : vector<2x128xf32> to vector<1x128xf32>
    %4 = vector.broadcast %3 : vector<1x128xf32> to vector<128x128xf32>
    %5 = arith.mulf %2, %4 : vector<128x128xf32>
    %6 = vector.extract_strided_slice %0 {offsets = [1, 0], sizes = [1, 128], strides = [1, 1]} : vector<2x128xf32> to vector<1x128xf32>
    %7 = vector.broadcast %6 : vector<1x128xf32> to vector<128x128xf32>
    %8 = arith.addf %5, %7 : vector<128x128xf32>
    %cst = arith.constant 0.000000e+00 : f32
    %9 = vector.broadcast %cst : f32 to vector<128x128xf32>
    %10 = arith.cmpf ogt, %8, %9 : vector<128x128xf32>
    %cst_5 = arith.constant 2.000000e-01 : f32
    %11 = vector.broadcast %cst_5 : f32 to vector<128x128xf32>
    %12 = arith.mulf %11, %8 : vector<128x128xf32>
    %13 = arith.select %10, %8, %12 : vector<128x128xi1>, vector<128x128xf32>
    %c0_6 = arith.constant 0 : index
    %c0_7 = arith.constant 0 : index
    %14 = vector.load %arg2[%c0_6, %c0_7] : memref<128x128xf32, #tpu.memory_space<vmem>>, vector<128x128xf32>
    %15 = vector.extract_strided_slice %1 {offsets = [0, 0], sizes = [1, 128], strides = [1, 1]} : vector<2x128xf32> to vector<1x128xf32>
    %16 = vector.broadcast %15 : vector<1x128xf32> to vector<128x128xf32>
    %17 = arith.mulf %14, %16 : vector<128x128xf32>
    %18 = vector.extract_strided_slice %1 {offsets = [1, 0], sizes = [1, 128], strides = [1, 1]} : vector<2x128xf32> to vector<1x128xf32>
    %19 = vector.broadcast %18 : vector<1x128xf32> to vector<128x128xf32>
    %20 = arith.addf %17, %19 : vector<128x128xf32>
    %cst_8 = arith.constant 0.000000e+00 : f32
    %21 = vector.broadcast %cst_8 : f32 to vector<128x128xf32>
    %22 = arith.cmpf ogt, %20, %21 : vector<128x128xf32>
    %cst_9 = arith.constant 2.000000e-01 : f32
    %23 = vector.broadcast %cst_9 : f32 to vector<128x128xf32>
    %24 = arith.mulf %23, %20 : vector<128x128xf32>
    %25 = arith.select %22, %20, %24 : vector<128x128xi1>, vector<128x128xf32>
    %26 = arith.addf %13, %25 : vector<128x128xf32>
    %cst_10 = arith.constant 5.000000e-01 : f32
    %27 = vector.broadcast %cst_10 : f32 to vector<128x128xf32>
    %28 = arith.mulf %26, %27 : vector<128x128xf32>
    %c0_11 = arith.constant 0 : index
    %c0_12 = arith.constant 0 : index
    %29 = vector.load %arg5[%c0_11, %c0_12] : memref<128x128xf32, #tpu.memory_space<vmem>>, vector<128x128xf32>
    tpu.vector_store %arg5[%c0_11, %c0_12], %28 {strides = array<i32>} : memref<128x128xf32, #tpu.memory_space<vmem>>, vector<128x128xf32>,
    return
  }
  func.func @transform_0(%arg0: i32) -> (i32, i32) {
    %c0_i32 = arith.constant 0 : i32
    %c0_i32_0 = arith.constant 0 : i32
    return %arg0, %c0_i32 : i32, i32
  }
  func.func @transform_1(%arg0: i32) -> (i32, i32) {
    %c0_i32 = arith.constant 0 : i32
    %c0_i32_0 = arith.constant 0 : i32
    return %arg0, %c0_i32 : i32, i32
  }
  func.func @transform_2(%arg0: i32) -> (i32, i32) {
    %c0_i32 = arith.constant 0 : i32
    %c0_i32_0 = arith.constant 0 : i32
    %c0_i32_1 = arith.constant 0 : i32
    return %c0_i32, %c0_i32_0 : i32, i32
  }
  func.func @transform_3(%arg0: i32) -> (i32, i32) {
    %c0_i32 = arith.constant 0 : i32
    %c0_i32_0 = arith.constant 0 : i32
    %c0_i32_1 = arith.constant 0 : i32
    return %c0_i32, %c0_i32_0 : i32, i32
  }
  func.func @transform_4(%arg0: i32) -> (i32, i32) {
    %c0_i32 = arith.constant 0 : i32
    %c0_i32_0 = arith.constant 0 : i32
    return %arg0, %c0_i32 : i32, i32
  }
}

</mosaic_0001>

<bundles_post_ra>
// kernel: down_block_forward.3
= control target key start
LH: loop header
LB: loop body
LE: loop exit
PB: predicated region body
PF: predicated region fallthrough
CT: control target
= control target key end

     0   :  { %s1187_s15 = smov 0   ;;  %s1433_s0 = inlined_call_operand.vmem [shape: bf16[2,9,9,16], index: 0, kind: input, shape index: {}]   ;;  %s1434_s1 = inlined_call_operand.vmem [shape: bf16[4,16,256], index: 1, kind: input, shape index: {}]   ;;  %s1435_s2 = inlined_call_operand.vmem [shape: f32[2,8,8,128], index: 2, kind: output, shape index: {0}]   ;;  %s1436_s3 = inlined_call_operand.vmem [shape: f32[2,8,8,128], index: 3, kind: output, shape index: {1}]   ;;  %s1437_s4 = inlined_call_operand.vmem [shape: f32[2,2,256], index: 4, kind: output, shape index: {2}]  }
   0x1 LB: > { %s1005_s16 = sadd.s32 4294967295, %s1160_s15   ;;  %p1009_p0 = scmp.ge.s32.totalorder %s1160_s15, 1  ;;  %s1160_s15 = sphi %s1187_s15, %s15_s15  }
   0x2   : > { %p167_p1 = scmp.lt.s32.totalorder %s1160_s15, 3 }
   0x4   : > { %p168_p2 = pnand %p1009_p0, %p167_p1 }
   0x5   : > { %p203_p3 = scmp.lt.s32.totalorder (!%p168_p2), %s1005_s16, 1 }
   0x6   : > { %171 = sbr.rel (%p168_p2) target bundleno = 298 (0x12a), region = 28 }
   0xb   : > { %v1037_v0 = vld [vmem:[%s1434_s1] sm:$0xf]  ;;  %v1134_v1 = vld [vmem:[%s1434_s1 + $0x4] sm:$0xf0]  ;;  %v1133_v2 = vld [vmem:[%s1434_s1 + $0x4] sm:$0xf] }
   0xc   : > { %v1038_v3 = vor.u32 %v1134_v1, %v1037_v0  ;;  %v1039_v4 = vld [vmem:[%s1434_s1 + $0x8] sm:$0xf0]  ;;  %v1021_v5 = vld [vmem:[%s1434_s1 + $0x10] sm:$0xf]  ;;  %v1136_v6 = vld [vmem:[%s1434_s1 + $0x14] sm:$0xf0] }
   0xd   : > { %v1042_v7 = vor.u32 %v1133_v2, %v1039_v4  ;;  %v1022_v8 = vor.u32 %v1136_v6, %v1021_v5  ;;  %v1135_v9 = vld [vmem:[%s1434_s1 + $0x14] sm:$0xf]  ;;  %v1023_v10 = vld [vmem:[%s1434_s1 + $0x18] sm:$0xf0]  ;;  %v1113_v14 = vld [vmem:[%s1434_s1 + $0x30] sm:$0xf] }
   0xe   : > { %428 = vmatpush.bf16.msra.mxu2 %v1038_v3  ;;  %v1026_v11 = vor.u32 %v1135_v9, %v1023_v10  ;;  %v1143_v12 = vld [vmem:[%s1434_s1 + $0x34] sm:$0xf]  ;;  %v1115_v13 = vld [vmem:[%s1434_s1 + $0x38] sm:$0xf0]  ;;  %s1439_s16 = smov (!%p203_p3, %s1005_s16), 1  ;;  %vm328_vm0 = vcmask 130048  }
   0xf   : > { %457 = vmatpush.bf16.msra.mxu3 %v1042_v7  ;;  %348 = vmatpush.bf16.msra.mxu0 %v1022_v8  ;;  %v1118_v15 = vor.u32 %v1143_v12, %v1115_v13  ;;  %v1144_v16 = vld [vmem:[%s1434_s1 + $0x34] sm:$0xf0]  ;;  %v1141_v17 = vld [vmem:[%s1434_s1 + $0x24] sm:$0xf]  ;;  %v1081_v19 = vld [vmem:[%s1434_s1 + $0x28] sm:$0xf0] }
  0x10   : > { %377 = vmatpush.bf16.msra.mxu1 %v1026_v11  ;;  %v1114_v18 = vor.u32 %v1144_v16, %v1113_v14  ;;  %v1079_v20 = vld [vmem:[%s1434_s1 + $0x20] sm:$0xf]  ;;  %v1142_v21 = vld [vmem:[%s1434_s1 + $0x24] sm:$0xf0]  ;;  %s1145_s25 = smul.u32 72, %s1439_s16  ;;  %v1084_v22 = vor.u32 %v1141_v17, %v1081_v19  ;;  %vm278_vm1 = vcmask 1046528  }
  0x11   : > { %v1080_v23 = vor.u32 %v1142_v21, %v1079_v20  ;;  %s1130_s29 = sshll.u32 %s1439_s16, 6  ;;  %s1132_s10 = sshll.u32 %s1439_s16, 2  ;;  %vm827_vm2 = vcmask 1040384  }
  0x12   : > { %715 = vmatpush.bf16.msrb.mxu2 %v1114_v18  ;;  %s1249_s28 = scalar_lea.vmem %s1433_s0, %s1145_s25  ;;  %s1375_s6 = scalar_lea.vmem %s1435_s2, %s1130_s29 }
  0x13   : > { %744 = vmatpush.bf16.msrb.mxu3 %v1118_v15  ;;  %532 = vmatpush.bf16.msrb.mxu0 %v1080_v23  ;;  %v224_v24 = vld [vmem:[%s1249_s28] sm:$0xf]  ;;  %v225_v25 = vld [vmem:[%s1249_s28 + $0x8] sm:$0xf]  ;;  %v246_v26 = vld [vmem:[%s1249_s28 + $0x4] sm:$0x1]  ;;  %s1382_s9 = scalar_lea.vmem %s1436_s3, %s1130_s29  ;;  %s222_s13 = scalar_lea.vmem %s1437_s4, %s1132_s10 }
  0x14   : > { %561 = vmatpush.bf16.msrb.mxu1 %v1084_v22  ;;  %v232_v27 = vunpack.c.l.bf16 %v224_v24  ;;  %v233_v28 = vunpack.c.l.bf16 %v225_v25  ;;  %v247_v29 = vld [vmem:[%s1249_s28 + $0xc] sm:$0x1]  ;;  %v254_v30 = vunpack.c.l.bf16 %v246_v26  ;;  %v226_v39 = vld [vmem:[%s1249_s28 + $0x10] sm:$0xf]  ;;  %v227_v41 = vld [vmem:[%s1249_s28 + $0x18] sm:$0xf] }
  0x15   : > { %v255_v31 = vunpack.c.l.bf16 %v247_v29  ;;  %v248_v42 = vld [vmem:[%s1249_s28 + $0x14] sm:$0x1]  ;;  %v249_v43 = vld [vmem:[%s1249_s28 + $0x1c] sm:$0x1]  ;;  %v234_v44 = vunpack.c.l.bf16 %v226_v39  ;;  %v235_v45 = vunpack.c.l.bf16 %v227_v41  ;;  %v228_v56 = vld [vmem:[%s1249_s28 + $0x20] sm:$0xf] }
  0x16   : > { %v240_v32 = vpack.c.bf16 %v233_v28, %v232_v27  ;;  %v279_v33 = vrot.slane %v232_v27, 1  ;;  %v282_v34 = vrot.slane %v233_v28, 1  ;;  %v280_v35 = vrot.slane %v254_v30, 1  ;;  %v229_v57 = vld [vmem:[%s1249_s28 + $0x28] sm:$0xf] }
  0x17   : > { %v283_v36 = vrot.slane %v255_v31, 1  ;;  %v256_v46 = vunpack.c.l.bf16 %v248_v42  ;;  %v257_v47 = vunpack.c.l.bf16 %v249_v43  ;;  %v285_v48 = vrot.slane %v234_v44, 1  ;;  %v250_v58 = vld [vmem:[%s1249_s28 + $0x24] sm:$0x1]  ;;  %v251_v59 = vld [vmem:[%s1249_s28 + $0x2c] sm:$0x1] }
  0x18   : > { %1043 = vmatmul.msk.bf16.vlgmr.msra.gmra.mxu2 %vm328_vm0, %v240_v32  ;;  %1047 = vmatmul.msk.bf16.vlgmr.msra.gmra.mxu3 %vm328_vm0, %v240_v32  ;;  %v281_v37 = vsel %vm278_vm1, %v279_v33, %v280_v35  ;;  %v288_v49 = vrot.slane %v235_v45, 1  ;;  %v241_v52 = vpack.c.bf16 %v235_v45, %v234_v44  ;;  %v236_v60 = vunpack.c.l.bf16 %v228_v56  ;;  %v230_v8 = vld [vmem:[%s1249_s28 + $0x30] sm:$0xf]  ;;  %v231_v9 = vld [vmem:[%s1249_s28 + $0x38] sm:$0xf] }
  0x19   : > { %v284_v38 = vsel %vm278_vm1, %v282_v34, %v283_v36  ;;  %v286_v50 = vrot.slane %v256_v46, 1  ;;  %v289_v51 = vrot.slane %v257_v47, 1  ;;  %v237_v61 = vunpack.c.l.bf16 %v229_v57  ;;  %v252_v10 = vld [vmem:[%s1249_s28 + $0x34] sm:$0x1]  ;;  %v253_v11 = vld [vmem:[%s1249_s28 + $0x3c] sm:$0x1] }
  0x1a   : > { %v311_v40 = vpack.c.bf16 %v284_v38, %v281_v37  ;;  %v258_v62 = vunpack.c.l.bf16 %v250_v58  ;;  %v259_v63 = vunpack.c.l.bf16 %v251_v59  ;;  %v291_v0 = vrot.slane %v236_v60, 1  ;;  %v1093_v23 = vld [vmem:[%s1249_s28 + $0x8] sm:$0xf]  ;;  %v1094_v24 = vld [vmem:[%s1249_s28 + $0xc] sm:$0x1] }
  0x1b   : > { %v287_v53 = vsel %vm278_vm1, %v285_v48, %v286_v50  ;;  %v290_v54 = vsel %vm278_vm1, %v288_v49, %v289_v51  ;;  %v294_v1 = vrot.slane %v237_v61, 1  ;;  %v242_v4 = vpack.c.bf16 %v237_v61, %v236_v60  ;;  %v1095_v25 = vld [vmem:[%s1249_s28 + $0x10] sm:$0xf]  ;;  %v1096_v26 = vld [vmem:[%s1249_s28 + $0x14] sm:$0x1] }
  0x1c   : > { %1027 = vmatmul.msk.bf16.vlgmr.msra.gmra.mxu0 %vm328_vm0, %v311_v40  ;;  %1031 = vmatmul.msk.bf16.vlgmr.msra.gmra.mxu1 %vm328_vm0, %v311_v40  ;;  %v312_v55 = vpack.c.bf16 %v290_v54, %v287_v53  ;;  %v292_v2 = vrot.slane %v258_v62, 1  ;;  %v295_v3 = vrot.slane %v259_v63, 1  ;;  %v238_v12 = vunpack.c.l.bf16 %v230_v8  ;;  %v1061_v39 = vld [vmem:[%s1249_s28 + $0x8] sm:$0xf]  ;;  %v1137_v40 = vld [vmem:[%s1249_s28 + $0xc] sm:$0xf0] }
  0x1d   : > { %v239_v13 = vunpack.c.l.bf16 %v231_v9  ;;  %v260_v14 = vunpack.c.l.bf16 %v252_v10  ;;  %v261_v15 = vunpack.c.l.bf16 %v253_v11  ;;  %v615_v28 = vunpack.c.l.bf16 %v1093_v23  ;;  %v1097_v41 = vld [vmem:[%s1249_s28 + $0x18] sm:$0xf]  ;;  %v1098_v42 = vld [vmem:[%s1249_s28 + $0x1c] sm:$0x1]  ;;  %v1099_v43 = vld [vmem:[%s1249_s28 + $0x20] sm:$0xf] }
  0x1e   : > { %v293_v5 = vsel %vm278_vm1, %v291_v0, %v292_v2  ;;  %v296_v6 = vsel %vm278_vm1, %v294_v1, %v295_v3  ;;  %v297_v16 = vrot.slane %v238_v12, 1  ;;  %v616_v29 = vunpack.c.l.bf16 %v1094_v24  ;;  %v1100_v44 = vld [vmem:[%s1249_s28 + $0x24] sm:$0x1]  ;;  %v1065_v57 = vld [vmem:[%s1249_s28 + $0x18] sm:$0xf] }
  0x1f   : > { %v313_v7 = vpack.c.bf16 %v296_v6, %v293_v5  ;;  %v300_v17 = vrot.slane %v239_v13, 1  ;;  %v298_v18 = vrot.slane %v260_v14, 1  ;;  %v301_v19 = vrot.slane %v261_v15, 1  ;;  %v1138_v58 = vld [vmem:[%s1249_s28 + $0x1c] sm:$0xf0] }
  0x20   : > { %v243_v20 = vpack.c.bf16 %v239_v13, %v238_v12  ;;  %v617_v30 = vunpack.c.l.bf16 %v1095_v25  ;;  %v618_v31 = vunpack.c.l.bf16 %v1096_v26  ;;  %v647_v32 = vrot.slane %v615_v28, 1  ;;  %v1101_v59 = vld [vmem:[%s1249_s28 + $0x28] sm:$0xf]  ;;  %v1102_v60 = vld [vmem:[%s1249_s28 + $0x2c] sm:$0x1] }
  0x21   : > { %v299_v21 = vsel %vm278_vm1, %v297_v16, %v298_v18  ;;  %v302_v22 = vsel %vm278_vm1, %v300_v17, %v301_v19  ;;  %v648_v33 = vrot.slane %v616_v29, 1  ;;  %v1062_v45 = vor.u32 %v1137_v40, %v1061_v39  ;;  %v1103_v61 = vld [vmem:[%s1249_s28 + $0x30] sm:$0xf]  ;;  %v1104_v62 = vld [vmem:[%s1249_s28 + $0x34] sm:$0x1] }
  0x22   : > { %v314_v27 = vpack.c.bf16 %v302_v22, %v299_v21  ;;  %v650_v34 = vrot.slane %v617_v30, 1  ;;  %v651_v35 = vrot.slane %v618_v31, 1  ;;  %v619_v46 = vunpack.c.l.bf16 %v1097_v41  ;;  %v1069_v11 = vld [vmem:[%s1249_s28 + $0x28] sm:$0xf]  ;;  %v1139_v12 = vld [vmem:[%s1249_s28 + $0x2c] sm:$0xf0] }
  0x23   : > { %v649_v36 = vsel %vm278_vm1, %v647_v32, %v648_v33  ;;  %v620_v47 = vunpack.c.l.bf16 %v1098_v42  ;;  %v621_v48 = vunpack.c.l.bf16 %v1099_v43  ;;  %v622_v49 = vunpack.c.l.bf16 %v1100_v44  ;;  %v1105_v13 = vld [vmem:[%s1249_s28 + $0x38] sm:$0xf]  ;;  %v1106_v14 = vld [vmem:[%s1249_s28 + $0x3c] sm:$0x1]  ;;  %v1107_v15 = vld [vmem:[%s1249_s28 + $0x40] sm:$0xf] }
  0x24   : > { %v652_v37 = vsel %vm278_vm1, %v650_v34, %v651_v35  ;;  %v653_v50 = vrot.slane %v619_v46, 1  ;;  %v1066_v63 = vor.u32 %v1138_v58, %v1065_v57  ;;  %v623_v0 = vunpack.c.l.bf16 %v1101_v59  ;;  %v1108_v16 = vld [vmem:[%s1249_s28 + $0x44] sm:$0x1]  ;;  %v1073_v29 = vld [vmem:[%s1249_s28 + $0x38] sm:$0xf] }
  0x25   : > { %v679_v38 = vpack.c.bf16 %v652_v37, %v649_v36  ;;  %v654_v51 = vrot.slane %v620_v47, 1  ;;  %v657_v53 = vrot.slane %v622_v49, 1  ;;  %v624_v1 = vunpack.c.l.bf16 %v1102_v60  ;;  %v1140_v30 = vld [vmem:[%s1249_s28 + $0x3c] sm:$0xf0] }
  0x26   : > { %v625_v2 = vunpack.c.l.bf16 %v1103_v61  ;;  %v626_v3 = vunpack.c.l.bf16 %v1104_v62  ;;  %v1070_v17 = vor.u32 %v1139_v12, %v1069_v11  ;;  %v627_v18 = vunpack.c.l.bf16 %v1105_v13 }
  0x27   : > { %v655_v54 = vsel %vm278_vm1, %v653_v50, %v654_v51  ;;  %v660_v5 = vrot.slane %v624_v1, 1  ;;  %v628_v19 = vunpack.c.l.bf16 %v1106_v14  ;;  %v630_v21 = vunpack.c.l.bf16 %v1108_v16 }
  0x28   : > { %1044 = vmatmul.msk.bf16.gmra.mxu2 %vm328_vm0, %v241_v52  ;;  %1048 = vmatmul.msk.bf16.gmra.mxu3 %vm328_vm0, %v241_v52  ;;  %v656_v52 = vrot.slane %v621_v48, 1  ;;  %v662_v6 = vrot.slane %v625_v2, 1  ;;  %v665_v22 = vrot.slane %v627_v18, 1  ;;  %v1074_v31 = vor.u32 %v1140_v30, %v1073_v29 }
  0x29   : > { %v666_v23 = vrot.slane %v628_v19, 1  ;;  %v669_v25 = vrot.slane %v630_v21, 1 }
  0x2b   : > { %v667_v26 = vsel %vm278_vm1, %v665_v22, %v666_v23 }
  0x2c   : > { %1028 = vmatmul.msk.bf16.gmra.mxu0 %vm328_vm0, %v312_v55  ;;  %1032 = vmatmul.msk.bf16.gmra.mxu1 %vm328_vm0, %v312_v55  ;;  %v658_v55 = vsel %vm278_vm1, %v656_v52, %v657_v53 }
  0x2d   : > { %v680_v56 = vpack.c.bf16 %v658_v55, %v655_v54 }
  0x38   : > { %1045 = vmatmul.msk.bf16.gmra.mxu2 %vm328_vm0, %v242_v4  ;;  %1049 = vmatmul.msk.bf16.gmra.mxu3 %vm328_vm0, %v242_v4  ;;  %v659_v4 = vrot.slane %v623_v0, 1 }
  0x3a   : > { %v661_v8 = vsel %vm278_vm1, %v659_v4, %v660_v5 }
  0x3c   : > { %1029 = vmatmul.msk.bf16.gmra.mxu0 %vm328_vm0, %v313_v7  ;;  %1033 = vmatmul.msk.bf16.gmra.mxu1 %vm328_vm0, %v313_v7  ;;  %v663_v7 = vrot.slane %v626_v3, 1 }
  0x3e   : > { %v664_v9 = vsel %vm278_vm1, %v662_v6, %v663_v7 }
  0x3f   : > { %v681_v10 = vpack.c.bf16 %v664_v9, %v661_v8 }
  0x48   : > { %1046 = vmatmul.msk.bf16.gmra.mxu2 %vm328_vm0, %v243_v20  ;;  %1050 = vmatmul.msk.bf16.gmra.mxu3 %vm328_vm0, %v243_v20  ;;  %v629_v20 = vunpack.c.l.bf16 %v1107_v15 }
  0x4a   : > { %v668_v24 = vrot.slane %v629_v20, 1 }
  0x4c   : > { %1030 = vmatmul.msk.bf16.gmra.mxu0 %vm328_vm0, %v314_v27  ;;  %1034 = vmatmul.msk.bf16.gmra.mxu1 %vm328_vm0, %v314_v27  ;;  %v670_v27 = vsel %vm278_vm1, %v668_v24, %v669_v25 }
  0x4d   : > { %v682_v28 = vpack.c.bf16 %v670_v27, %v667_v26 }
  0x58   : > { %1119 = vmatmul.msk.bf16.vlgmr.msrb.gmra.mxu2 %vm328_vm0, %v679_v38  ;;  %1123 = vmatmul.msk.bf16.vlgmr.msrb.gmra.mxu3 %vm328_vm0, %v679_v38 }
  0x5c   : > { %1085 = vmatmul.msk.bf16.vlgmr.msrb.gmra.mxu0 %vm328_vm0, %v1062_v45  ;;  %1089 = vmatmul.msk.bf16.vlgmr.msrb.gmra.mxu1 %vm328_vm0, %v1062_v45 }
  0x68   : > { %1120 = vmatmul.msk.bf16.gmra.mxu2 %vm328_vm0, %v680_v56  ;;  %1124 = vmatmul.msk.bf16.gmra.mxu3 %vm328_vm0, %v680_v56 }
  0x6c   : > { %1086 = vmatmul.msk.bf16.gmra.mxu0 %vm328_vm0, %v1066_v63  ;;  %1090 = vmatmul.msk.bf16.gmra.mxu1 %vm328_vm0, %v1066_v63 }
  0x78   : > { %1121 = vmatmul.msk.bf16.gmra.mxu2 %vm328_vm0, %v681_v10  ;;  %1125 = vmatmul.msk.bf16.gmra.mxu3 %vm328_vm0, %v681_v10 }
  0x7c   : > { %1087 = vmatmul.msk.bf16.gmra.mxu0 %vm328_vm0, %v1070_v17  ;;  %1091 = vmatmul.msk.bf16.gmra.mxu1 %vm328_vm0, %v1070_v17 }
  0x88   : > { %1122 = vmatmul.msk.bf16.gmra.mxu2 %vm328_vm0, %v682_v28  ;;  %1126 = vmatmul.msk.bf16.gmra.mxu3 %vm328_vm0, %v682_v28 }
  0x8c   : > { %1088 = vmatmul.msk.bf16.gmra.mxu0 %vm328_vm0, %v1074_v31  ;;  %1092 = vmatmul.msk.bf16.gmra.mxu1 %vm328_vm0, %v1074_v31 }
  0x99   : > { %v350_v32 = vpop.f32.mrf.mxu0  ;;  %v379_v33 = vpop.f32.mrf.mxu1 }
  0x9b   : > { %v430_v34 = vpop.f32.mrf.mxu2  ;;  %v459_v35 = vpop.f32.mrf.mxu3 }
  0x9c   : > { %v431_v0 = vadd.f32 %v430_v34, %v350_v32  ;;  %v460_v1 = vadd.f32 %v459_v35, %v379_v33 }
  0xa1   : > { %v352_v36 = vpop.f32.mrf.mxu0  ;;  %v381_v37 = vpop.f32.mrf.mxu1 }
  0xa3   : > { %v432_v38 = vpop.f32.mrf.mxu2  ;;  %v461_v39 = vpop.f32.mrf.mxu3 }
  0xa4   : > { %v433_v10 = vadd.f32 %v432_v38, %v352_v36  ;;  %v462_v11 = vadd.f32 %v461_v39, %v381_v37 }
  0xa9   : > { %v355_v40 = vpop.f32.mrf.mxu0  ;;  %v384_v41 = vpop.f32.mrf.mxu1 }
  0xab   : > { %v435_v42 = vpop.f32.mrf.mxu2  ;;  %v464_v43 = vpop.f32.mrf.mxu3 }
  0xac   : > { %v436_v20 = vadd.f32 %v435_v42, %v355_v40  ;;  %v465_v21 = vadd.f32 %v464_v43, %v384_v41 }
  0xb1   : > { %v357_v44 = vpop.f32.mrf.mxu0  ;;  %v386_v45 = vpop.f32.mrf.mxu1 }
  0xb3   : > { %v437_v46 = vpop.f32.mrf.mxu2  ;;  %v466_v47 = vpop.f32.mrf.mxu3 }
  0xb4   : > { %v438_v30 = vadd.f32 %v437_v46, %v357_v44  ;;  %v467_v31 = vadd.f32 %v466_v47, %v386_v45 }
  0xb9   : > { %v1339_v48 = vpop.f32.mrf.mxu0  ;;  %v1341_v49 = vpop.f32.mrf.mxu1 }
  0xbb   : > { %v1343_v50 = vpop.f32.mrf.mxu2  ;;  %v1345_v51 = vpop.f32.mrf.mxu3 }
  0xbc   : > { %v441_v40 = vadd.f32 %v1343_v50, %v1339_v48  ;;  %v470_v41 = vadd.f32 %v1345_v51, %v1341_v49 }
  0xc1   : > { %v1347_v52 = vpop.f32.mrf.mxu0  ;;  %v1349_v53 = vpop.f32.mrf.mxu1 }
  0xc3   : > { %v1351_v54 = vpop.f32.mrf.mxu2  ;;  %v1353_v55 = vpop.f32.mrf.mxu3 }
  0xc4   : > { %v472_v48 = vadd.f32 %v1353_v55, %v1349_v53 }
  0xc9   : > { %v1355_v56 = vpop.f32.mrf.mxu0  ;;  %v1357_v57 = vpop.f32.mrf.mxu1 }
  0xcb   : > { %v1359_v58 = vpop.f32.mrf.mxu2  ;;  %v1361_v59 = vpop.f32.mrf.mxu3 }
  0xd1   : > { %v1363_v60 = vpop.f32.mrf.mxu0  ;;  %v1365_v61 = vpop.f32.mrf.mxu1 }
  0xd3   : > { %v1367_v62 = vpop.f32.mrf.mxu2  ;;  %v1369_v63 = vpop.f32.mrf.mxu3 }
  0xd9   : > { %v534_v2 = vpop.f32.mrf.mxu0  ;;  %v563_v3 = vpop.f32.mrf.mxu1 }
  0xda   : > { %v583_v4 = vadd.f32 %v534_v2, %v431_v0  ;;  %v584_v5 = vadd.f32 %v563_v3, %v460_v1  ;;  %v443_v2 = vadd.f32 %v1351_v54, %v1347_v52  ;;  %v475_v52 = vadd.f32 %v1361_v59, %v1357_v57 }
  0xdb   : > { %v717_v6 = vpop.f32.mrf.mxu2  ;;  %v746_v7 = vpop.f32.mrf.mxu3 }
  0xdc   : > { %v1377_v8 = vadd.f32 %v717_v6, %v583_v4  ;;  %v1384_v9 = vadd.f32 %v746_v7, %v584_v5 }
  0xde   : > { %782 = vst [vmem:[%s1375_s6] sm:$0xff] %v1377_v8  ;;  %v835_v53 = vmul.f32 %v1377_v8, %v1377_v8  ;;  %v836_v54 = vmul.f32 %v1384_v9, %v1384_v9 }
  0xdf   : > { %790 = vst [vmem:[%s1382_s9] sm:$0xff] %v1384_v9 }
  0xe1   : > { %v536_v12 = vpop.f32.mrf.mxu0  ;;  %v565_v13 = vpop.f32.mrf.mxu1 }
  0xe2   : > { %v585_v14 = vadd.f32 %v536_v12, %v433_v10  ;;  %v586_v15 = vadd.f32 %v565_v13, %v462_v11  ;;  %v446_v12 = vadd.f32 %v1359_v58, %v1355_v56 }
  0xe3   : > { %v719_v16 = vpop.f32.mrf.mxu2  ;;  %v748_v17 = vpop.f32.mrf.mxu3 }
  0xe4   : > { %v768_v18 = vadd.f32 %v719_v16, %v585_v14  ;;  %v769_v19 = vadd.f32 %v748_v17, %v586_v15 }
  0xe6   : > { %783 = vst [vmem:[%s1375_s6 + $0x8] sm:$0xff] %v768_v18  ;;  %v837_v10 = vmul.f32 %v768_v18, %v768_v18  ;;  %v838_v11 = vmul.f32 %v769_v19, %v769_v19  ;;  %v798_v16 = vadd.f32 %v768_v18, %v1377_v8  ;;  %v811_v17 = vadd.f32 %v769_v19, %v1384_v9 }
  0xe7   : > { %791 = vst [vmem:[%s1382_s9 + $0x8] sm:$0xff] %v769_v19 }
  0xe8   : > { %v851_v56 = vadd.f32 %v837_v10, %v835_v53  ;;  %v864_v58 = vadd.f32 %v838_v11, %v836_v54 }
  0xe9   : > { %v539_v22 = vpop.f32.mrf.mxu0  ;;  %v568_v23 = vpop.f32.mrf.mxu1 }
  0xea   : > { %v587_v24 = vadd.f32 %v539_v22, %v436_v20  ;;  %v588_v25 = vadd.f32 %v568_v23, %v465_v21 }
  0xeb   : > { %v722_v26 = vpop.f32.mrf.mxu2  ;;  %v751_v27 = vpop.f32.mrf.mxu3 }
  0xec   : > { %v770_v28 = vadd.f32 %v722_v26, %v587_v24  ;;  %v771_v29 = vadd.f32 %v751_v27, %v588_v25 }
  0xee   : > { %784 = vst [vmem:[%s1375_s6 + $0x10] sm:$0xff] %v770_v28  ;;  %v839_v55 = vmul.f32 %v770_v28, %v770_v28  ;;  %v840_v13 = vmul.f32 %v771_v29, %v771_v29  ;;  %v799_v24 = vadd.f32 %v798_v16, %v770_v28  ;;  %v812_v25 = vadd.f32 %v811_v17, %v771_v29 }
  0xef   : > { %792 = vst [vmem:[%s1382_s9 + $0x10] sm:$0xff] %v771_v29  ;;  %v477_v28 = vadd.f32 %v1369_v63, %v1365_v61 }
  0xf1   : > { %v541_v32 = vpop.f32.mrf.mxu0  ;;  %v570_v33 = vpop.f32.mrf.mxu1 }
  0xf2   : > { %v589_v34 = vadd.f32 %v541_v32, %v438_v30  ;;  %v590_v35 = vadd.f32 %v570_v33, %v467_v31  ;;  %v852_v30 = vadd.f32 %v851_v56, %v839_v55  ;;  %v865_v31 = vadd.f32 %v864_v58, %v840_v13 }
  0xf3   : > { %v724_v36 = vpop.f32.mrf.mxu2  ;;  %v753_v37 = vpop.f32.mrf.mxu3  ;;  %v830_v56 = vlaneseq }
  0xf4   : > { %v772_v38 = vadd.f32 %v724_v36, %v589_v34  ;;  %v773_v39 = vadd.f32 %v753_v37, %v590_v35  ;;  %v448_v36 = vadd.f32 %v1367_v62, %v1363_v60 }
  0xf5   : > { %vm832_vm3 = vcmp.lt.s32.totalorder %v830_v56, 256 }
  0xf6   : > { %785 = vst [vmem:[%s1375_s6 + $0x18] sm:$0xff] %v772_v38  ;;  %v841_v57 = vmul.f32 %v772_v38, %v772_v38  ;;  %v842_v59 = vmul.f32 %v773_v39, %v773_v39  ;;  %v800_v18 = vadd.f32 %v799_v24, %v772_v38  ;;  %v813_v9 = vadd.f32 %v812_v25, %v773_v39 }
  0xf7   : > { %793 = vst [vmem:[%s1382_s9 + $0x18] sm:$0xff] %v773_v39 }
  0xf8   : > { %v853_v19 = vadd.f32 %v852_v30, %v841_v57  ;;  %v866_v33 = vadd.f32 %v865_v31, %v842_v59 }
  0xf9   : > { %v544_v42 = vpop.f32.mrf.mxu0  ;;  %v573_v43 = vpop.f32.mrf.mxu1 }
  0xfa   : > { %v591_v44 = vadd.f32 %v544_v42, %v441_v40  ;;  %v592_v45 = vadd.f32 %v573_v43, %v470_v41 }
  0xfb   : > { %v727_v46 = vpop.f32.mrf.mxu2  ;;  %v756_v47 = vpop.f32.mrf.mxu3 }
  0xfc   : > { %v774_v0 = vadd.f32 %v727_v46, %v591_v44  ;;  %v775_v1 = vadd.f32 %v756_v47, %v592_v45 }
  0xfe   : > { %786 = vst [vmem:[%s1375_s6 + $0x20] sm:$0xff] %v774_v0  ;;  %v843_v32 = vmul.f32 %v774_v0, %v774_v0  ;;  %v844_v8 = vmul.f32 %v775_v1, %v775_v1  ;;  %v801_v29 = vadd.f32 %v800_v18, %v774_v0  ;;  %v814_v37 = vadd.f32 %v813_v9, %v775_v1 }
  0xff   : > { %794 = vst [vmem:[%s1382_s9 + $0x20] sm:$0xff] %v775_v1 }
 0x100   : > { %v854_v40 = vadd.f32 %v853_v19, %v843_v32  ;;  %v867_v41 = vadd.f32 %v866_v33, %v844_v8 }
 0x101   : > { %v546_v50 = vpop.f32.mrf.mxu0  ;;  %v575_v49 = vpop.f32.mrf.mxu1 }
 0x102   : > { %v593_v51 = vadd.f32 %v546_v50, %v443_v2  ;;  %v594_v3 = vadd.f32 %v575_v49, %v472_v48 }
 0x103   : > { %v729_v4 = vpop.f32.mrf.mxu2  ;;  %v758_v5 = vpop.f32.mrf.mxu3 }
 0x104   : > { %v776_v6 = vadd.f32 %v729_v4, %v593_v51  ;;  %v777_v7 = vadd.f32 %v758_v5, %v594_v3 }
 0x106   : > { %787 = vst [vmem:[%s1375_s6 + $0x28] sm:$0xff] %v776_v6  ;;  %v845_v34 = vmul.f32 %v776_v6, %v776_v6  ;;  %v846_v35 = vmul.f32 %v777_v7, %v777_v7  ;;  %v802_v44 = vadd.f32 %v801_v29, %v776_v6  ;;  %v815_v45 = vadd.f32 %v814_v37, %v777_v7 }
 0x107   : > { %795 = vst [vmem:[%s1382_s9 + $0x28] sm:$0xff] %v777_v7 }
 0x108   : > { %v855_v2 = vadd.f32 %v854_v40, %v845_v34  ;;  %v868_v48 = vadd.f32 %v867_v41, %v846_v35 }
 0x109   : > { %v549_v14 = vpop.f32.mrf.mxu0  ;;  %v578_v15 = vpop.f32.mrf.mxu1 }
 0x10a   : > { %v595_v20 = vadd.f32 %v549_v14, %v446_v12  ;;  %v596_v21 = vadd.f32 %v578_v15, %v475_v52 }
 0x10b   : > { %v732_v22 = vpop.f32.mrf.mxu2  ;;  %v761_v23 = vpop.f32.mrf.mxu3 }
 0x10c   : > { %v778_v26 = vadd.f32 %v732_v22, %v595_v20  ;;  %v779_v27 = vadd.f32 %v761_v23, %v596_v21 }
 0x10e   : > { %788 = vst [vmem:[%s1375_s6 + $0x30] sm:$0xff] %v778_v26  ;;  %v847_v42 = vmul.f32 %v778_v26, %v778_v26  ;;  %v848_v43 = vmul.f32 %v779_v27, %v779_v27  ;;  %v803_v50 = vadd.f32 %v802_v44, %v778_v26  ;;  %v816_v61 = vadd.f32 %v815_v45, %v779_v27 }
 0x10f   : > { %796 = vst [vmem:[%s1382_s9 + $0x30] sm:$0xff] %v779_v27 }
 0x110   : > { %v856_v1 = vadd.f32 %v855_v2, %v847_v42  ;;  %v869_v49 = vadd.f32 %v868_v48, %v848_v43 }
 0x111   : > { %v551_v38 = vpop.f32.mrf.mxu0  ;;  %v580_v39 = vpop.f32.mrf.mxu1 }
 0x112   : > { %v597_v46 = vadd.f32 %v551_v38, %v448_v36  ;;  %v598_v47 = vadd.f32 %v580_v39, %v477_v28 }
 0x113   : > { %v734_v60 = vpop.f32.mrf.mxu2  ;;  %v763_v62 = vpop.f32.mrf.mxu3 }
 0x114   : > { %v780_v63 = vadd.f32 %v734_v60, %v597_v46  ;;  %v781_v0 = vadd.f32 %v763_v62, %v598_v47 }
 0x116   : > { %789 = vst [vmem:[%s1375_s6 + $0x38] sm:$0xff] %v780_v63  ;;  %v804_v51 = vadd.f32 %v803_v50, %v780_v63  ;;  %v849_v3 = vmul.f32 %v780_v63, %v780_v63  ;;  %v817_v4 = vadd.f32 %v816_v61, %v781_v0  ;;  %v850_v5 = vmul.f32 %v781_v0, %v781_v0 }
 0x117   : > { %797 = vst [vmem:[%s1382_s9 + $0x38] sm:$0xff] %v781_v0 }
 0x118   : > { %v805_v6 = vrot.slane %v804_v51, 4  ;;  %v857_v7 = vadd.f32 %v856_v1, %v849_v3  ;;  %v818_v10 = vrot.slane %v817_v4, 4  ;;  %v870_v11 = vadd.f32 %v869_v49, %v850_v5 }
 0x11a   : > { %v806_v12 = vadd.f32 %v805_v6, %v804_v51  ;;  %v858_v52 = vrot.slane %v857_v7, 4  ;;  %v819_v53 = vadd.f32 %v818_v10, %v817_v4  ;;  %v871_v54 = vrot.slane %v870_v11, 4 }
 0x11c   : > { %v807_v55 = vrot.slane %v806_v12, 2  ;;  %v859_v13 = vadd.f32 %v858_v52, %v857_v7  ;;  %v820_v14 = vrot.slane %v819_v53, 2  ;;  %v872_v15 = vadd.f32 %v871_v54, %v870_v11 }
 0x11e   : > { %v808_v16 = vadd.f32 %v807_v55, %v806_v12  ;;  %v860_v17 = vrot.slane %v859_v13, 2  ;;  %v821_v20 = vadd.f32 %v820_v14, %v819_v53  ;;  %v873_v21 = vrot.slane %v872_v15, 2 }
 0x120   : > { %v809_v58 = vrot.slane %v808_v16, 1  ;;  %v861_v57 = vadd.f32 %v860_v17, %v859_v13  ;;  %v822_v59 = vrot.slane %v821_v20, 1  ;;  %v874_v22 = vadd.f32 %v873_v21, %v872_v15 }
 0x122   : > { %v862_v23 = vrot.slane %v861_v57, 1  ;;  %v823_v24 = vadd.f32 %v822_v59, %v821_v20  ;;  %v875_v25 = vrot.slane %v874_v22, 1  ;;  %v810_v26 = vadd.f32 %v809_v58, %v808_v16 }
 0x124   : > { %v826_v27 = vrot.slane %v823_v24, 7  ;;  %v876_v30 = vadd.f32 %v875_v25, %v874_v22  ;;  %v863_v31 = vadd.f32 %v862_v23, %v861_v57 }
 0x126   : > { %v828_v32 = vsel %vm827_vm2, %v810_v26, %v826_v27  ;;  %v879_v8 = vrot.slane %v876_v30, 7 }
 0x127   : > { %834 = vst.msk [vmem:[%s222_s13] ss:$2 sm:$0x3] %vm832_vm3, %v828_v32 }
 0x128   : > { %v880_v18 = vsel %vm827_vm2, %v863_v31, %v879_v8 }
 0x129   : > { %1127 = vst.msk [vmem:[%s222_s13 + $0x1] ss:$2 sm:$0x3] %vm832_vm3, %v880_v18 }
 0x12a PF: > { %s15_s15 = sadd.s32 1, %s1160_s15  }
 0x12b   : > { %p12_p4 = scmp.ge.s32.totalorder %s15_s15, 4  }
 0x12d   :  { %14 = sbr.rel (!%p12_p4) target bundleno = 1 (0x1), region = 87 }

// kernel: down_block_forward.5
= control target key start
LH: loop header
LB: loop body
LE: loop exit
PB: predicated region body
PF: predicated region fallthrough
CT: control target
= control target key end

     0   :  { %s514_s0 = inlined_call_operand.vmem [shape: f32[128,128], index: 0, kind: input, shape index: {}]   ;;  %s515_s1 = inlined_call_operand.vmem [shape: f32[128,128], index: 1, kind: input, shape index: {}]   ;;  %s516_s2 = inlined_call_operand.vmem [shape: f32[2,128], index: 2, kind: input, shape index: {}]   ;;  %s517_s3 = inlined_call_operand.vmem [shape: f32[2,128], index: 3, kind: input, shape index: {}]   ;;  %s518_s4 = inlined_call_operand.vmem [shape: f32[128,128], index: 4, kind: output, shape index: {}]  }
   0x1   :  { %v17_v0 = vld [vmem:[%s516_s2] sm:$0x3]  ;;  %v20_v8 = vld [vmem:[%s514_s0 + $0x8] sm:$0xff]  ;;  %v21_v10 = vld [vmem:[%s514_s0 + $0x10] sm:$0xff] }
   0x2   :  { %v18_v1 = vld [vmem:[%s517_s3] sm:$0x3]  ;;  %v301_v3 = vperm.slane %v17_v0, 0  ;;  %v303_v4 = vperm.slane %v17_v0, 1  ;;  %v118_v9 = vld [vmem:[%s515_s1 + $0x8] sm:$0xff]  ;;  %v119_v11 = vld [vmem:[%s515_s1 + $0x10] sm:$0xff] }
   0x3   :  { %v19_v2 = vld [vmem:[%s514_s0] sm:$0xff]  ;;  %v308_v6 = vperm.slane %v18_v1, 0  ;;  %v310_v7 = vperm.slane %v18_v1, 1  ;;  %v22_v16 = vld [vmem:[%s514_s0 + $0x18] sm:$0xff]  ;;  %v24_v45 = vld [vmem:[%s514_s0 + $0x28] sm:$0xff] }
   0x4   :  { %v117_v5 = vld [vmem:[%s515_s1] sm:$0xff]  ;;  %v36_v12 = vmul.f32 %v301_v3, %v19_v2  ;;  %v37_v14 = vmul.f32 %v301_v3, %v20_v8  ;;  %v120_v17 = vld [vmem:[%s515_s1 + $0x18] sm:$0xff]  ;;  %v38_v18 = vmul.f32 %v301_v3, %v21_v10  ;;  %v39_v20 = vmul.f32 %v301_v3, %v22_v16  ;;  %v122_v46 = vld [vmem:[%s515_s1 + $0x28] sm:$0xff] }
   0x5   :  { %v134_v13 = vmul.f32 %v308_v6, %v117_v5  ;;  %v135_v15 = vmul.f32 %v308_v6, %v118_v9  ;;  %v136_v19 = vmul.f32 %v308_v6, %v119_v11  ;;  %v137_v21 = vmul.f32 %v308_v6, %v120_v17  ;;  %v23_v40 = vld [vmem:[%s514_s0 + $0x20] sm:$0xff]  ;;  %v25_v54 = vld [vmem:[%s514_s0 + $0x30] sm:$0xff]  ;;  %v26_v8 = vld [vmem:[%s514_s0 + $0x38] sm:$0xff] }
   0x6   :  { %v53_v22 = vadd.f32 %v303_v4, %v36_v12  ;;  %v54_v24 = vadd.f32 %v303_v4, %v37_v14  ;;  %v55_v26 = vadd.f32 %v303_v4, %v38_v18  ;;  %v56_v28 = vadd.f32 %v303_v4, %v39_v20  ;;  %v121_v41 = vld [vmem:[%s515_s1 + $0x20] sm:$0xff]  ;;  %v123_v55 = vld [vmem:[%s515_s1 + $0x30] sm:$0xff]  ;;  %v124_v18 = vld [vmem:[%s515_s1 + $0x38] sm:$0xff] }
   0x7   :  { %v151_v23 = vadd.f32 %v310_v7, %v134_v13  ;;  %v152_v25 = vadd.f32 %v310_v7, %v135_v15  ;;  %v153_v27 = vadd.f32 %v310_v7, %v136_v19  ;;  %v154_v29 = vadd.f32 %v310_v7, %v137_v21 }
   0x8   :  { %vm69_vm0 = vcmp.gt.f32.partialorder %v53_v22, 0.0  ;;  %v85_v30 = vmul.f32 0.2, %v53_v22  ;;  %vm70_vm2 = vcmp.gt.f32.partialorder %v54_v24, 0.0  ;;  %v86_v32 = vmul.f32 0.2, %v54_v24 }
   0x9   :  { %vm167_vm1 = vcmp.gt.f32.partialorder %v151_v23, 0.0  ;;  %v183_v31 = vmul.f32 0.2, %v151_v23  ;;  %vm168_vm3 = vcmp.gt.f32.partialorder %v152_v25, 0.0  ;;  %v184_v33 = vmul.f32 0.2, %v152_v25 }
   0xa   :  { %v101_v34 = vsel %vm69_vm0, %v53_v22, %v85_v30  ;;  %vm71_vm4 = vcmp.gt.f32.partialorder %v55_v26, 0.0  ;;  %v87_v36 = vmul.f32 0.2, %v55_v26  ;;  %v102_v38 = vsel %vm70_vm2, %v54_v24, %v86_v32  ;;  %v27_v22 = vld [vmem:[%s514_s0 + $0x40] sm:$0xff] }
   0xb   :  { %v199_v35 = vsel %vm167_vm1, %v151_v23, %v183_v31  ;;  %v200_v39 = vsel %vm168_vm3, %v152_v25, %v184_v33  ;;  %vm169_vm5 = vcmp.gt.f32.partialorder %v153_v27, 0.0  ;;  %v185_v44 = vmul.f32 0.2, %v153_v27 }
   0xc   :  { %v215_v37 = vadd.f32 %v199_v35, %v101_v34  ;;  %v216_v42 = vadd.f32 %v200_v39, %v102_v38  ;;  %v103_v43 = vsel %vm71_vm4, %v55_v26, %v87_v36  ;;  %vm72_vm6 = vcmp.gt.f32.partialorder %v56_v28, 0.0  ;;  %v28_v34 = vld [vmem:[%s514_s0 + $0x48] sm:$0xff] }
   0xd   :  { %v88_v48 = vmul.f32 0.2, %v56_v28  ;;  %vm170_vm7 = vcmp.gt.f32.partialorder %v154_v29, 0.0  ;;  %v186_v49 = vmul.f32 0.2, %v154_v29  ;;  %v201_v51 = vsel %vm169_vm5, %v153_v27, %v185_v44 }
   0xe   :  { %v231_v47 = vmul.f32 0.5, %v215_v37  ;;  %v232_v50 = vmul.f32 0.5, %v216_v42  ;;  %v40_v52 = vmul.f32 %v301_v3, %v23_v40  ;;  %v138_v53 = vmul.f32 %v308_v6, %v121_v41  ;;  %v126_v42 = vld [vmem:[%s515_s1 + $0x48] sm:$0xff] }
   0xf   :  { %v217_v56 = vadd.f32 %v201_v51, %v103_v43  ;;  %v104_v57 = vsel %vm72_vm6, %v56_v28, %v88_v48  ;;  %v202_v58 = vsel %vm170_vm7, %v154_v29, %v186_v49  ;;  %v41_v59 = vmul.f32 %v301_v3, %v24_v45  ;;  %v125_v29 = vld [vmem:[%s515_s1 + $0x40] sm:$0xff]  ;;  %v29_v43 = vld [vmem:[%s514_s0 + $0x50] sm:$0xff] }
  0x10   :  { %247 = vst [vmem:[%s518_s4] sm:$0xff] %v231_v47  ;;  %v218_v60 = vadd.f32 %v202_v58, %v104_v57  ;;  %v57_v61 = vadd.f32 %v303_v4, %v40_v52  ;;  %v155_v62 = vadd.f32 %v310_v7, %v138_v53  ;;  %v139_v63 = vmul.f32 %v308_v6, %v122_v46 }
  0x11   :  { %248 = vst [vmem:[%s518_s4 + $0x8] sm:$0xff] %v232_v50  ;;  %v233_v0 = vmul.f32 0.5, %v217_v56  ;;  %v58_v1 = vadd.f32 %v303_v4, %v41_v59  ;;  %v42_v2 = vmul.f32 %v301_v3, %v25_v54  ;;  %v140_v5 = vmul.f32 %v308_v6, %v123_v55  ;;  %v127_v54 = vld [vmem:[%s515_s1 + $0x50] sm:$0xff]  ;;  %v30_v55 = vld [vmem:[%s514_s0 + $0x58] sm:$0xff] }
  0x12   :  { %v234_v9 = vmul.f32 0.5, %v218_v60  ;;  %vm73_vm8 = vcmp.gt.f32.partialorder %v57_v61, 0.0  ;;  %v89_v10 = vmul.f32 0.2, %v57_v61  ;;  %vm171_vm9 = vcmp.gt.f32.partialorder %v155_v62, 0.0 }
  0x13   :  { %249 = vst [vmem:[%s518_s4 + $0x10] sm:$0xff] %v233_v0  ;;  %v187_v11 = vmul.f32 0.2, %v155_v62  ;;  %vm74_vm10 = vcmp.gt.f32.partialorder %v58_v1, 0.0  ;;  %v90_v12 = vmul.f32 0.2, %v58_v1  ;;  %v156_v13 = vadd.f32 %v310_v7, %v139_v63 }
  0x14   :  { %250 = vst [vmem:[%s518_s4 + $0x18] sm:$0xff] %v234_v9  ;;  %v105_v14 = vsel %vm73_vm8, %v57_v61, %v89_v10  ;;  %v59_v15 = vadd.f32 %v303_v4, %v42_v2  ;;  %v157_v16 = vadd.f32 %v310_v7, %v140_v5  ;;  %v43_v17 = vmul.f32 %v301_v3, %v26_v8  ;;  %v128_v2 = vld [vmem:[%s515_s1 + $0x58] sm:$0xff]  ;;  %v31_v5 = vld [vmem:[%s514_s0 + $0x60] sm:$0xff] }
  0x15   :  { %v203_v19 = vsel %vm171_vm9, %v155_v62, %v187_v11  ;;  %v106_v20 = vsel %vm74_vm10, %v58_v1, %v90_v12  ;;  %vm172_vm11 = vcmp.gt.f32.partialorder %v156_v13, 0.0  ;;  %v188_v21 = vmul.f32 0.2, %v156_v13 }
  0x16   :  { %v219_v23 = vadd.f32 %v203_v19, %v105_v14  ;;  %vm75_vm12 = vcmp.gt.f32.partialorder %v59_v15, 0.0  ;;  %v91_v24 = vmul.f32 0.2, %v59_v15  ;;  %vm173_vm13 = vcmp.gt.f32.partialorder %v157_v16, 0.0  ;;  %v32_v19 = vld [vmem:[%s514_s0 + $0x68] sm:$0xff] }
  0x17   :  { %v204_v25 = vsel %vm172_vm11, %v156_v13, %v188_v21  ;;  %v189_v26 = vmul.f32 0.2, %v157_v16  ;;  %v60_v27 = vadd.f32 %v303_v4, %v43_v17  ;;  %v141_v28 = vmul.f32 %v308_v6, %v124_v18  ;;  %v129_v18 = vld [vmem:[%s515_s1 + $0x60] sm:$0xff] }
  0x18   :  { %v235_v30 = vmul.f32 0.5, %v219_v23  ;;  %v220_v31 = vadd.f32 %v204_v25, %v106_v20  ;;  %v107_v32 = vsel %vm75_vm12, %v59_v15, %v91_v24  ;;  %v44_v33 = vmul.f32 %v301_v3, %v27_v22 }
  0x19   :  { %v205_v35 = vsel %vm173_vm13, %v157_v16, %v189_v26  ;;  %vm76_vm14 = vcmp.gt.f32.partialorder %v60_v27, 0.0  ;;  %v92_v36 = vmul.f32 0.2, %v60_v27  ;;  %v158_v37 = vadd.f32 %v310_v7, %v141_v28 }
  0x1a   :  { %251 = vst [vmem:[%s518_s4 + $0x20] sm:$0xff] %v235_v30  ;;  %v236_v38 = vmul.f32 0.5, %v220_v31  ;;  %v221_v39 = vadd.f32 %v205_v35, %v107_v32  ;;  %v61_v40 = vadd.f32 %v303_v4, %v44_v33  ;;  %v142_v41 = vmul.f32 %v308_v6, %v125_v29  ;;  %v130_v30 = vld [vmem:[%s515_s1 + $0x68] sm:$0xff]  ;;  %v33_v31 = vld [vmem:[%s514_s0 + $0x70] sm:$0xff] }
  0x1b   :  { %v108_v44 = vsel %vm76_vm14, %v60_v27, %v92_v36  ;;  %vm174_vm15 = vcmp.gt.f32.partialorder %v158_v37, 0.0  ;;  %v190_v45 = vmul.f32 0.2, %v158_v37  ;;  %v45_v46 = vmul.f32 %v301_v3, %v28_v34 }
  0x1c   :  { %252 = vst [vmem:[%s518_s4 + $0x28] sm:$0xff] %v236_v38  ;;  %v237_v47 = vmul.f32 0.5, %v221_v39  ;;  %vm77_vm0 = vcmp.gt.f32.partialorder %v61_v40, 0.0  ;;  %v93_v48 = vmul.f32 0.2, %v61_v40  ;;  %v159_v49 = vadd.f32 %v310_v7, %v142_v41 }
  0x1d   :  { %v206_v50 = vsel %vm174_vm15, %v158_v37, %v190_v45  ;;  %v62_v51 = vadd.f32 %v303_v4, %v45_v46  ;;  %v143_v52 = vmul.f32 %v308_v6, %v126_v42  ;;  %v46_v53 = vmul.f32 %v301_v3, %v29_v43  ;;  %v131_v42 = vld [vmem:[%s515_s1 + $0x70] sm:$0xff]  ;;  %v34_v43 = vld [vmem:[%s514_s0 + $0x78] sm:$0xff] }
  0x1e   :  { %253 = vst [vmem:[%s518_s4 + $0x30] sm:$0xff] %v237_v47  ;;  %v222_v56 = vadd.f32 %v206_v50, %v108_v44  ;;  %v109_v57 = vsel %vm77_vm0, %v61_v40, %v93_v48  ;;  %vm175_vm1 = vcmp.gt.f32.partialorder %v159_v49, 0.0  ;;  %v191_v58 = vmul.f32 0.2, %v159_v49 }
  0x1f   :  { %vm78_vm2 = vcmp.gt.f32.partialorder %v62_v51, 0.0  ;;  %v94_v59 = vmul.f32 0.2, %v62_v51  ;;  %v160_v60 = vadd.f32 %v310_v7, %v143_v52  ;;  %v63_v61 = vadd.f32 %v303_v4, %v46_v53 }
  0x20   :  { %v238_v62 = vmul.f32 0.5, %v222_v56  ;;  %v207_v63 = vsel %vm175_vm1, %v159_v49, %v191_v58  ;;  %v144_v0 = vmul.f32 %v308_v6, %v127_v54  ;;  %v47_v1 = vmul.f32 %v301_v3, %v30_v55  ;;  %v132_v54 = vld [vmem:[%s515_s1 + $0x78] sm:$0xff] }
  0x21   :  { %v223_v8 = vadd.f32 %v207_v63, %v109_v57  ;;  %v110_v9 = vsel %vm78_vm2, %v62_v51, %v94_v59  ;;  %vm176_vm3 = vcmp.gt.f32.partialorder %v160_v60, 0.0  ;;  %v192_v10 = vmul.f32 0.2, %v160_v60 }
  0x22   :  { %254 = vst [vmem:[%s518_s4 + $0x38] sm:$0xff] %v238_v62  ;;  %vm79_vm4 = vcmp.gt.f32.partialorder %v63_v61, 0.0  ;;  %v95_v11 = vmul.f32 0.2, %v63_v61  ;;  %v161_v12 = vadd.f32 %v310_v7, %v144_v0  ;;  %v64_v13 = vadd.f32 %v303_v4, %v47_v1 }
  0x23   :  { %v239_v14 = vmul.f32 0.5, %v223_v8  ;;  %v208_v15 = vsel %vm176_vm3, %v160_v60, %v192_v10  ;;  %v145_v16 = vmul.f32 %v308_v6, %v128_v2  ;;  %v48_v17 = vmul.f32 %v301_v3, %v31_v5 }
  0x24   :  { %v224_v20 = vadd.f32 %v208_v15, %v110_v9  ;;  %v111_v21 = vsel %vm79_vm4, %v63_v61, %v95_v11  ;;  %vm177_vm5 = vcmp.gt.f32.partialorder %v161_v12, 0.0  ;;  %v193_v22 = vmul.f32 0.2, %v161_v12 }
  0x25   :  { %255 = vst [vmem:[%s518_s4 + $0x40] sm:$0xff] %v239_v14  ;;  %vm80_vm6 = vcmp.gt.f32.partialorder %v64_v13, 0.0  ;;  %v96_v23 = vmul.f32 0.2, %v64_v13  ;;  %v162_v24 = vadd.f32 %v310_v7, %v145_v16  ;;  %v65_v25 = vadd.f32 %v303_v4, %v48_v17 }
  0x26   :  { %v240_v26 = vmul.f32 0.5, %v224_v20  ;;  %v209_v27 = vsel %vm177_vm5, %v161_v12, %v193_v22  ;;  %v146_v28 = vmul.f32 %v308_v6, %v129_v18  ;;  %v49_v29 = vmul.f32 %v301_v3, %v32_v19 }
  0x27   :  { %v225_v32 = vadd.f32 %v209_v27, %v111_v21  ;;  %v112_v33 = vsel %vm80_vm6, %v64_v13, %v96_v23  ;;  %vm178_vm7 = vcmp.gt.f32.partialorder %v162_v24, 0.0  ;;  %v194_v34 = vmul.f32 0.2, %v162_v24 }
  0x28   :  { %256 = vst [vmem:[%s518_s4 + $0x48] sm:$0xff] %v240_v26  ;;  %vm81_vm8 = vcmp.gt.f32.partialorder %v65_v25, 0.0  ;;  %v97_v35 = vmul.f32 0.2, %v65_v25  ;;  %v163_v36 = vadd.f32 %v310_v7, %v146_v28  ;;  %v66_v37 = vadd.f32 %v303_v4, %v49_v29 }
  0x29   :  { %v241_v38 = vmul.f32 0.5, %v225_v32  ;;  %v210_v39 = vsel %vm178_vm7, %v162_v24, %v194_v34  ;;  %v147_v40 = vmul.f32 %v308_v6, %v130_v30  ;;  %v50_v41 = vmul.f32 %v301_v3, %v33_v31 }
  0x2a   :  { %v226_v44 = vadd.f32 %v210_v39, %v112_v33  ;;  %v113_v45 = vsel %vm81_vm8, %v65_v25, %v97_v35  ;;  %vm179_vm9 = vcmp.gt.f32.partialorder %v163_v36, 0.0  ;;  %v195_v46 = vmul.f32 0.2, %v163_v36 }
  0x2b   :  { %257 = vst [vmem:[%s518_s4 + $0x50] sm:$0xff] %v241_v38  ;;  %vm82_vm10 = vcmp.gt.f32.partialorder %v66_v37, 0.0  ;;  %v98_v47 = vmul.f32 0.2, %v66_v37  ;;  %v164_v48 = vadd.f32 %v310_v7, %v147_v40  ;;  %v67_v49 = vadd.f32 %v303_v4, %v50_v41 }
  0x2c   :  { %v242_v50 = vmul.f32 0.5, %v226_v44  ;;  %v211_v51 = vsel %vm179_vm9, %v163_v36, %v195_v46  ;;  %v148_v52 = vmul.f32 %v308_v6, %v131_v42  ;;  %v51_v53 = vmul.f32 %v301_v3, %v34_v43 }
  0x2d   :  { %v227_v55 = vadd.f32 %v211_v51, %v113_v45  ;;  %v114_v56 = vsel %vm82_vm10, %v66_v37, %v98_v47  ;;  %vm180_vm11 = vcmp.gt.f32.partialorder %v164_v48, 0.0  ;;  %v196_v57 = vmul.f32 0.2, %v164_v48 }
  0x2e   :  { %258 = vst [vmem:[%s518_s4 + $0x58] sm:$0xff] %v242_v50  ;;  %vm83_vm12 = vcmp.gt.f32.partialorder %v67_v49, 0.0  ;;  %v99_v58 = vmul.f32 0.2, %v67_v49  ;;  %v165_v59 = vadd.f32 %v310_v7, %v148_v52  ;;  %v68_v60 = vadd.f32 %v303_v4, %v51_v53 }
  0x2f   :  { %v243_v61 = vmul.f32 0.5, %v227_v55  ;;  %v212_v3 = vsel %vm180_vm11, %v164_v48, %v196_v57  ;;  %v149_v62 = vmul.f32 %v308_v6, %v132_v54 }
  0x30   :  { %v228_v63 = vadd.f32 %v212_v3, %v114_v56  ;;  %v115_v0 = vsel %vm83_vm12, %v67_v49, %v99_v58  ;;  %vm181_vm13 = vcmp.gt.f32.partialorder %v165_v59, 0.0  ;;  %v197_v1 = vmul.f32 0.2, %v165_v59 }
  0x31   :  { %259 = vst [vmem:[%s518_s4 + $0x60] sm:$0xff] %v243_v61  ;;  %vm84_vm14 = vcmp.gt.f32.partialorder %v68_v60, 0.0  ;;  %v100_v2 = vmul.f32 0.2, %v68_v60  ;;  %v166_v5 = vadd.f32 %v310_v7, %v149_v62 }
  0x32   :  { %v244_v8 = vmul.f32 0.5, %v228_v63  ;;  %v213_v9 = vsel %vm181_vm13, %v165_v59, %v197_v1 }
  0x33   :  { %v229_v10 = vadd.f32 %v213_v9, %v115_v0  ;;  %v116_v4 = vsel %vm84_vm14, %v68_v60, %v100_v2  ;;  %vm182_vm15 = vcmp.gt.f32.partialorder %v166_v5, 0.0  ;;  %v198_v11 = vmul.f32 0.2, %v166_v5 }
  0x34   :  { %260 = vst [vmem:[%s518_s4 + $0x68] sm:$0xff] %v244_v8 }
  0x35   :  { %v245_v6 = vmul.f32 0.5, %v229_v10  ;;  %v214_v12 = vsel %vm182_vm15, %v166_v5, %v198_v11 }
  0x36   :  { %v230_v13 = vadd.f32 %v214_v12, %v116_v4 }
  0x37   :  { %261 = vst [vmem:[%s518_s4 + $0x70] sm:$0xff] %v245_v6 }
  0x38   :  { %v246_v14 = vmul.f32 0.5, %v230_v13 }
  0x3a   :  { %262 = vst [vmem:[%s518_s4 + $0x78] sm:$0xff] %v246_v14 }

// kernel: down_block_forward.4
= control target key start
LH: loop header
LB: loop body
LE: loop exit
PB: predicated region body
PF: predicated region fallthrough
CT: control target
= control target key end

     0   :  { %s1990_s15 = smov 0   ;;  %s2452_s0 = inlined_call_operand.vmem [shape: f32[2,8,8,128], index: 0, kind: input, shape index: {}]   ;;  %s2453_s1 = inlined_call_operand.vmem [shape: f32[2,128], index: 1, kind: input, shape index: {}]   ;;  %s2454_s2 = inlined_call_operand.vmem [shape: bf16[9,128,128], index: 2, kind: input, shape index: {}]   ;;  %s2455_s3 = inlined_call_operand.vmem [shape: f32[2,8,8,128], index: 3, kind: output, shape index: {0}]   ;;  %s2456_s4 = inlined_call_operand.vmem [shape: f32[2,2,128], index: 4, kind: output, shape index: {1}]  }
   0x1 LB: > { %s1429_s16 = sadd.s32 4294967295, %s1962_s15   ;;  %p1433_p0 = scmp.ge.s32.totalorder %s1962_s15, 1  ;;  %s1962_s15 = sphi %s1990_s15, %s15_s15  }
   0x2   : > { %p165_p1 = scmp.lt.s32.totalorder %s1962_s15, 3 }
   0x4   : > { %p166_p2 = pnand %p1433_p0, %p165_p1 }
   0x5   : > { %p195_p3 = scmp.lt.s32.totalorder (!%p166_p2), %s1429_s16, 1 }
   0x6   : > { %169 = sbr.rel (%p166_p2) target bundleno = 346 (0x15a), region = 32 }
   0xb   : > { %v1874_v0 = vld [vmem:[%s2454_s2 + $0x78] sm:$0xff]  ;;  %v1964_v2 = vmov 0.0   ;;  %v1873_v3 = vld [vmem:[%s2454_s2 + $0x70] sm:$0xff]  ;;  %s2458_s16 = smov (!%p195_p3, %s1429_s16), 1  ;;  %v1872_v6 = vld [vmem:[%s2454_s2 + $0x68] sm:$0xff] }
   0xc   : > { %v1882_v1 = vld [vmem:[%s2454_s2 + $0xb8] sm:$0xff]  ;;  %268 = vst [vmem:[#allocation2 + $0x40] sm:$0xff] %v1964_v2  ;;  %1931 = vmatpush.bf16.msra.mxu1 %v1874_v0  ;;  %394 = vmatpush.bf16.msra.mxu0 %v1874_v0  ;;  %v1881_v4 = vld [vmem:[%s2454_s2 + $0xb0] sm:$0xff]  ;;  %s1857_s27 = sshll.u32 %s2458_s16, 6  ;;  %v209_v8 = vld [vmem:[%s2453_s1] sm:$0x3] }
   0xd   : > { %269 = vst [vmem:[#allocation2 + $0x48] sm:$0x3] %v1964_v2  ;;  %577 = vmatpush.bf16.msra.mxu2 %v1882_v1  ;;  %v1890_v5 = vld [vmem:[%s2454_s2 + $0xf8] sm:$0xff]  ;;  %v1889_v7 = vld [vmem:[%s2454_s2 + $0xf0] sm:$0xff]  ;;  %s2031_s8 = scalar_lea.vmem %s2452_s0, %s1857_s27  ;;  %v2039_v11 = vperm.slane %v209_v8, 0  ;;  %v2041_v12 = vperm.slane %v209_v8, 1  ;;  %s2420_s9 = scalar_lea.vmem %s2455_s3, %s1857_s27 }
   0xe   : > { %270 = vst [vmem:[#allocation2 + $0x50] sm:$0xff] %v1964_v2  ;;  %691 = vmatpush.bf16.msra.mxu3 %v1890_v5  ;;  %v213_v9 = vld [vmem:[%s2031_s8 + $0x18] sm:$0xff]  ;;  %v214_v10 = vld [vmem:[%s2031_s8 + $0x20] sm:$0xff]  ;;  %v1880_v13 = vld [vmem:[%s2454_s2 + $0xa8] sm:$0xff]  ;;  %s1438_s27 = sshll.u32 %s2458_s16, 1 }
   0xf   : > { %271 = vst [vmem:[#allocation2 + $0x58] sm:$0x3] %v1964_v2  ;;  %v222_v14 = vmul.f32 %v2039_v11, %v213_v9  ;;  %v223_v15 = vmul.f32 %v2039_v11, %v214_v10  ;;  %v210_v16 = vld [vmem:[%s2031_s8] sm:$0xff]  ;;  %v1888_v17 = vld [vmem:[%s2454_s2 + $0xe8] sm:$0xff]  ;;  %v1870_v29 = vld [vmem:[%s2454_s2 + $0x58] sm:$0xff]  ;;  %s208_s12 = scalar_lea.vmem %s2456_s4, %s1438_s27 }
  0x10   : > { %260 = vst [vmem:[#allocation2] sm:$0xff] %v1964_v2  ;;  %1932 = vmatpush.bf16.msra.mxu1 %v1873_v3  ;;  %395 = vmatpush.bf16.msra.mxu0 %v1873_v3  ;;  %v219_v18 = vmul.f32 %v2039_v11, %v210_v16  ;;  %v1871_v19 = vld [vmem:[%s2454_s2 + $0x60] sm:$0xff]  ;;  %v215_v23 = vld [vmem:[%s2031_s8 + $0x28] sm:$0xff]  ;;  %v216_v31 = vld [vmem:[%s2031_s8 + $0x30] sm:$0xff] }
  0x11   : > { %261 = vst [vmem:[#allocation2 + $0x8] sm:$0x3] %v1964_v2  ;;  %578 = vmatpush.bf16.msra.mxu2 %v1881_v4  ;;  %v231_v20 = vadd.f32 %v2041_v12, %v222_v14  ;;  %v232_v21 = vadd.f32 %v2041_v12, %v223_v15  ;;  %v1879_v22 = vld [vmem:[%s2454_s2 + $0xa0] sm:$0xff]  ;;  %v224_v28 = vmul.f32 %v2039_v11, %v215_v23  ;;  %v211_v32 = vld [vmem:[%s2031_s8 + $0x8] sm:$0xff]  ;;  %v1878_v33 = vld [vmem:[%s2454_s2 + $0x98] sm:$0xff] }
  0x12   : > { %262 = vst [vmem:[#allocation2 + $0x10] sm:$0xff] %v1964_v2  ;;  %692 = vmatpush.bf16.msra.mxu3 %v1889_v7  ;;  %v1887_v26 = vld [vmem:[%s2454_s2 + $0xe0] sm:$0xff]  ;;  %v228_v27 = vadd.f32 %v2041_v12, %v219_v18  ;;  %v225_v35 = vmul.f32 %v2039_v11, %v216_v31  ;;  %v212_v36 = vld [vmem:[%s2031_s8 + $0x10] sm:$0xff]  ;;  %v220_v38 = vmul.f32 %v2039_v11, %v211_v32  ;;  %v1886_v41 = vld [vmem:[%s2454_s2 + $0xd8] sm:$0xff] }
  0x13   : > { %263 = vst [vmem:[#allocation2 + $0x18] sm:$0x3] %v1964_v2  ;;  %vm239_vm0 = vcmp.gt.f32.partialorder %v231_v20, 0.0  ;;  %vm240_vm1 = vcmp.gt.f32.partialorder %v232_v21, 0.0  ;;  %v247_v24 = vmul.f32 0.2, %v231_v20  ;;  %v233_v37 = vadd.f32 %v2041_v12, %v224_v28 }
  0x14   : > { %264 = vst [vmem:[#allocation2 + $0x20] sm:$0xff] %v1964_v2  ;;  %1933 = vmatpush.bf16.msra.mxu1 %v1872_v6  ;;  %396 = vmatpush.bf16.msra.mxu0 %v1872_v6  ;;  %v248_v25 = vmul.f32 0.2, %v232_v21  ;;  %v221_v39 = vmul.f32 %v2039_v11, %v212_v36  ;;  %v244_v40 = vmul.f32 0.2, %v228_v27  ;;  %v234_v42 = vadd.f32 %v2041_v12, %v225_v35  ;;  %v1869_v43 = vld [vmem:[%s2454_s2 + $0x50] sm:$0xff] }
  0x15   : > { %265 = vst [vmem:[#allocation2 + $0x28] sm:$0x3] %v1964_v2  ;;  %579 = vmatpush.bf16.msra.mxu2 %v1880_v13  ;;  %v2077_v30 = vsel %vm239_vm0, %v231_v20, %v247_v24  ;;  %vm236_vm2 = vcmp.gt.f32.partialorder %v228_v27, 0.0  ;;  %v229_v44 = vadd.f32 %v2041_v12, %v220_v38  ;;  %v1877_v46 = vld [vmem:[%s2454_s2 + $0x90] sm:$0xff]  ;;  %v249_v47 = vmul.f32 0.2, %v233_v37 }
  0x16   : > { %266 = vst [vmem:[#allocation2 + $0x30] sm:$0xff] %v1964_v2  ;;  %693 = vmatpush.bf16.msra.mxu3 %v1888_v17  ;;  %v2086_v34 = vsel %vm240_vm1, %v232_v21, %v248_v25  ;;  %v230_v45 = vadd.f32 %v2041_v12, %v221_v39  ;;  %v1885_v48 = vld [vmem:[%s2454_s2 + $0xd0] sm:$0xff]  ;;  %v250_v49 = vmul.f32 0.2, %v234_v42  ;;  %v2115_v51 = vsel %vm236_vm2, %v228_v27, %v244_v40  ;;  %v1868_v53 = vld [vmem:[%s2454_s2 + $0x48] sm:$0xff]  ;;  %v1867_v60 = vld [vmem:[%s2454_s2 + $0x40] sm:$0xff] }
  0x17   : > { %267 = vst [vmem:[#allocation2 + $0x38] sm:$0x3] %v1964_v2  ;;  %v245_v50 = vmul.f32 0.2, %v229_v44  ;;  %vm241_vm3 = vcmp.gt.f32.partialorder %v233_v37, 0.0  ;;  %vm237_vm4 = vcmp.gt.f32.partialorder %v229_v44, 0.0  ;;  %v2158_v3 = vpack.c.bf16 %v2086_v34, %v2077_v30 }
  0x18   : > { %1934 = vmatpush.bf16.msra.mxu1 %v1871_v19  ;;  %397 = vmatpush.bf16.msra.mxu0 %v1871_v19  ;;  %272 = vst [vmem:[#allocation2 + $0x60] sm:$0xff] %v1964_v2  ;;  %v246_v52 = vmul.f32 0.2, %v230_v45  ;;  %vm242_vm5 = vcmp.gt.f32.partialorder %v234_v42, 0.0  ;;  %vm238_vm6 = vcmp.gt.f32.partialorder %v230_v45, 0.0  ;;  %v1876_v54 = vld [vmem:[%s2454_s2 + $0x88] sm:$0xff]  ;;  %v2126_v55 = vsel %vm241_vm3, %v233_v37, %v249_v47 }
  0x19   : > { %580 = vmatpush.bf16.msra.mxu2 %v1879_v22  ;;  %284 = vst [vmem:[#allocation2 + $0x41] sm:$0xff] %v2077_v30  ;;  %v2128_v56 = vsel %vm237_vm4, %v229_v44, %v245_v50  ;;  %v1884_v57 = vld [vmem:[%s2454_s2 + $0xc8] sm:$0xff]  ;;  %v2133_v58 = vsel %vm242_vm5, %v234_v42, %v250_v49  ;;  %v1866_v62 = vld [vmem:[%s2454_s2 + $0x38] sm:$0xff]  ;;  %v1875_v63 = vld [vmem:[%s2454_s2 + $0x80] sm:$0xff] }
  0x1a   : > { %285 = vst [vmem:[#allocation2 + $0x51] sm:$0xff] %v2086_v34  ;;  %694 = vmatpush.bf16.msra.mxu3 %v1887_v26  ;;  %v2136_v59 = vsel %vm238_vm6, %v230_v45, %v246_v52  ;;  %v317_v61 = vld [vmem:[#allocation2 + $0x1] sm:$0xff]  ;;  %v1898_v0 = vld [vmem:[%s2454_s2 + $0x138] sm:$0xff]  ;;  %v1865_v7 = vld [vmem:[%s2454_s2 + $0x30] sm:$0xff]  ;;  %v2222_v31 = vpack.c.bf16 %v2133_v58, %v2126_v55 }
  0x1b   : > { %273 = vst [vmem:[#allocation2 + $0x68] sm:$0x3] %v1964_v2  ;;  %v1914_v1 = vld [vmem:[%s2454_s2 + $0x1b8] sm:$0xff]  ;;  %v325_v4 = vpack.c.bf16 %v2115_v51, %v317_v61  ;;  %v500_v5 = vld [vmem:[#allocation2 + $0x2] sm:$0xff]  ;;  %v1897_v13 = vld [vmem:[%s2454_s2 + $0x130] sm:$0xff]  ;;  %v2226_v32 = vpack.c.bf16 %v2136_v59, %v2128_v56 }
  0x1c   : > { %1935 = vmatpush.bf16.msra.mxu1 %v1870_v29  ;;  %398 = vmatpush.bf16.msra.mxu0 %v1870_v29  ;;  %274 = vst [vmem:[#allocation2 + $0x70] sm:$0xff] %v1964_v2  ;;  %v1883_v6 = vld [vmem:[%s2454_s2 + $0xc0] sm:$0xff]  ;;  %v1922_v9 = vld [vmem:[%s2454_s2 + $0x1f8] sm:$0xff]  ;;  %v1913_v15 = vld [vmem:[%s2454_s2 + $0x1b0] sm:$0xff] }
  0x1d   : > { %581 = vmatpush.bf16.msra.mxu2 %v1878_v33  ;;  %275 = vst [vmem:[#allocation2 + $0x78] sm:$0x3] %v1964_v2  ;;  %v1864_v17 = vld [vmem:[%s2454_s2 + $0x28] sm:$0xff]  ;;  %v1921_v19 = vld [vmem:[%s2454_s2 + $0x1f0] sm:$0xff]  ;;  %v1863_v22 = vld [vmem:[%s2454_s2 + $0x20] sm:$0xff] }
  0x1e   : > { %276 = vst [vmem:[#allocation2 + $0x80] sm:$0xff] %v1964_v2  ;;  %695 = vmatpush.bf16.msra.mxu3 %v1886_v41  ;;  %v1896_v20 = vld [vmem:[%s2454_s2 + $0x128] sm:$0xff]  ;;  %v1895_v24 = vld [vmem:[%s2454_s2 + $0x120] sm:$0xff]  ;;  %v1862_v26 = vld [vmem:[%s2454_s2 + $0x18] sm:$0xff] }
  0x1f   : > { %277 = vst [vmem:[#allocation2 + $0x88] sm:$0x3] %v1964_v2  ;;  %v1912_v21 = vld [vmem:[%s2454_s2 + $0x1a8] sm:$0xff]  ;;  %v1911_v25 = vld [vmem:[%s2454_s2 + $0x1a0] sm:$0xff]  ;;  %v1894_v29 = vld [vmem:[%s2454_s2 + $0x118] sm:$0xff] }
  0x20   : > { %1936 = vmatpush.bf16.msra.mxu1 %v1869_v43  ;;  %399 = vmatpush.bf16.msra.mxu0 %v1869_v43  ;;  %278 = vst [vmem:[#allocation2 + $0x90] sm:$0xff] %v1964_v2  ;;  %v1920_v23 = vld [vmem:[%s2454_s2 + $0x1e8] sm:$0xff]  ;;  %v2234_v36 = vld [vmem:[#allocation2 + $0x40] sm:$0xff]  ;;  %v1861_v37 = vld [vmem:[%s2454_s2 + $0x10] sm:$0xff] }
  0x21   : > { %582 = vmatpush.bf16.msra.mxu2 %v1877_v46  ;;  %279 = vst [vmem:[#allocation2 + $0x98] sm:$0x3] %v1964_v2  ;;  %v1893_v38 = vld [vmem:[%s2454_s2 + $0x110] sm:$0xff]  ;;  %v1910_v40 = vld [vmem:[%s2454_s2 + $0x198] sm:$0xff]  ;;  %v1919_v41 = vld [vmem:[%s2454_s2 + $0x1e0] sm:$0xff] }
  0x22   : > { %281 = vst [vmem:[#allocation2 + $0x11] sm:$0xff] %v2115_v51  ;;  %696 = vmatpush.bf16.msra.mxu3 %v1885_v48  ;;  %v1860_v42 = vld [vmem:[%s2454_s2 + $0x8] sm:$0xff]  ;;  %v1909_v44 = vld [vmem:[%s2454_s2 + $0x190] sm:$0xff]  ;;  %v1918_v45 = vld [vmem:[%s2454_s2 + $0x1d8] sm:$0xff] }
  0x23   : > { %286 = vst [vmem:[#allocation2 + $0x61] sm:$0xff] %v2126_v55  ;;  %v1892_v43 = vld [vmem:[%s2454_s2 + $0x108] sm:$0xff]  ;;  %v217_v46 = vld [vmem:[%s2031_s8 + $0x38] sm:$0xff]  ;;  %v1859_v48 = vld [vmem:[%s2454_s2] sm:$0xff] }
  0x24   : > { %1937 = vmatpush.bf16.msra.mxu1 %v1868_v53  ;;  %400 = vmatpush.bf16.msra.mxu0 %v1868_v53  ;;  %287 = vst [vmem:[#allocation2 + $0x71] sm:$0xff] %v2133_v58  ;;  %v226_v47 = vmul.f32 %v2039_v11, %v217_v46  ;;  %v1906_v49 = vld [vmem:[%s2454_s2 + $0x178] sm:$0xff]  ;;  %v1891_v50 = vld [vmem:[%s2454_s2 + $0x100] sm:$0xff] }
  0x25   : > { %583 = vmatpush.bf16.msra.mxu2 %v1876_v54  ;;  %282 = vst [vmem:[#allocation2 + $0x21] sm:$0xff] %v2128_v56  ;;  %v1930_v11 = vld [vmem:[%s2454_s2 + $0x238] sm:$0xff]  ;;  %v2280_v54 = vld [vmem:[#allocation2 + $0x42] sm:$0xff] }
  0x26   : > { %283 = vst [vmem:[#allocation2 + $0x31] sm:$0xff] %v2136_v59  ;;  %697 = vmatpush.bf16.msra.mxu3 %v1884_v57  ;;  %v235_v52 = vadd.f32 %v2041_v12, %v226_v47  ;;  %v2282_v57 = vld [vmem:[#allocation2 + $0x52] sm:$0xff] }
  0x28   : > { %1938 = vmatpush.bf16.msra.mxu1 %v1867_v60  ;;  %401 = vmatpush.bf16.msra.mxu0 %v1867_v60  ;;  %v251_v53 = vmul.f32 0.2, %v235_v52  ;;  %vm243_vm7 = vcmp.gt.f32.partialorder %v235_v52, 0.0  ;;  %v1905_v60 = vld [vmem:[%s2454_s2 + $0x170] sm:$0xff] }
  0x29   : > { %584 = vmatpush.bf16.msra.mxu2 %v1875_v63  ;;  %v2167_v8 = vld [vmem:[#allocation2 + $0x12] sm:$0xff]  ;;  %v2296_v63 = vpack.c.bf16 %v2282_v57, %v2280_v54 }
  0x2a   : > { %v508_v10 = vpack.c.bf16 %v2167_v8, %v500_v5  ;;  %v2176_v14 = vld [vmem:[#allocation2 + $0x10] sm:$0xff]  ;;  %698 = vmatpush.bf16.msra.mxu3 %v1883_v6  ;;  %v2287_v61 = vsel %vm243_vm7, %v235_v52, %v251_v53  ;;  %v738_v5 = vpack.c.bf16 %v2126_v55, %v2086_v34  ;;  %v1928_v6 = vld [vmem:[%s2454_s2 + $0x228] sm:$0xff]  ;;  %v1903_v34 = vld [vmem:[%s2454_s2 + $0x160] sm:$0xff] }
  0x2b   : > { %412 = vmatmul.bf16.vlgmr.msra.gmra.mxu1 %v2158_v3  ;;  %402 = vmatmul.bf16.vlgmr.msra.gmra.mxu0 %v325_v4  ;;  %v297_v12 = vpack.c.bf16 %v2176_v14, %v1964_v2  ;;  %288 = vst [vmem:[#allocation2 + $0x81] sm:$0xff] %v2287_v61  ;;  %v1929_v4 = vld [vmem:[%s2454_s2 + $0x230] sm:$0xff]  ;;  %v1904_v2 = vld [vmem:[%s2454_s2 + $0x168] sm:$0xff] }
  0x2c   : > { %471 = vmatpush.bf16.msrb.mxu1 %v1866_v62  ;;  %805 = vmatpush.bf16.msrb.mxu0 %v1898_v0  ;;  %v2182_v16 = vld [vmem:[#allocation2 + $0x20] sm:$0xff]  ;;  %v736_v62 = vpack.c.bf16 %v2128_v56, %v2115_v51  ;;  %v618_v0 = vld [vmem:[#allocation2 + $0x50] sm:$0xff]  ;;  %v1908_v51 = vld [vmem:[%s2454_s2 + $0x188] sm:$0xff] }
  0x2d   : > { %1034 = vmatpush.bf16.msrb.mxu2 %v1914_v1  ;;  %v622_v18 = vpack.c.bf16 %v2182_v16, %v2176_v14  ;;  %v2213_v27 = vld [vmem:[#allocation2 + $0x22] sm:$0xff]  ;;  %v2215_v28 = vld [vmem:[#allocation2 + $0x32] sm:$0xff] }
  0x2e   : > { %585 = vmatmul.bf16.vlgmr.msra.gmra.mxu2 %v508_v10  ;;  %1148 = vmatpush.bf16.msrb.mxu3 %v1922_v9  ;;  %v2230_v33 = vpack.c.bf16 %v2215_v28, %v2213_v27  ;;  %v2232_v35 = vld [vmem:[#allocation2 + $0x30] sm:$0xff]  ;;  %v2298_v1 = vld [vmem:[#allocation2 + $0x60] sm:$0xff]  ;;  %v1916_v55 = vld [vmem:[%s2454_s2 + $0x1c8] sm:$0xff] }
  0x2f   : > { %699 = vmatmul.bf16.vlgmr.msra.gmra.mxu3 %v622_v18  ;;  %v623_v39 = vpack.c.bf16 %v2234_v36, %v2232_v35  ;;  %v624_v56 = vpack.c.bf16 %v2298_v1, %v618_v0  ;;  %v1907_v9 = vld [vmem:[%s2454_s2 + $0x180] sm:$0xff]  ;;  %v298_v18 = vpack.c.bf16 %v2232_v35, %v2182_v16  ;;  %v1926_v16 = vld [vmem:[%s2454_s2 + $0x218] sm:$0xff]  ;;  %v851_v35 = vpack.c.bf16 %v2280_v54, %v2215_v28 }
  0x30   : > { %472 = vmatpush.bf16.msrb.mxu1 %v1865_v7  ;;  %806 = vmatpush.bf16.msrb.mxu0 %v1897_v13  ;;  %v1917_v7 = vld [vmem:[%s2454_s2 + $0x1d0] sm:$0xff]  ;;  %v1927_v10 = vld [vmem:[%s2454_s2 + $0x220] sm:$0xff]  ;;  %v1902_v13 = vld [vmem:[%s2454_s2 + $0x158] sm:$0xff] }
  0x31   : > { %1035 = vmatpush.bf16.msrb.mxu2 %v1913_v15  ;;  %v2334_v14 = vld [vmem:[#allocation2 + $0x62] sm:$0xff]  ;;  %v2336_v15 = vld [vmem:[#allocation2 + $0x72] sm:$0xff] }
  0x32   : > { %1149 = vmatpush.bf16.msrb.mxu3 %v1921_v19  ;;  %v737_v19 = vpack.c.bf16 %v2077_v30, %v2136_v59  ;;  %v1915_v30 = vld [vmem:[%s2454_s2 + $0x1c0] sm:$0xff]  ;;  %v850_v59 = vpack.c.bf16 %v2213_v27, %v2167_v8  ;;  %v299_v8 = vpack.c.bf16 %v618_v0, %v2234_v36  ;;  %v739_v36 = vpack.c.bf16 %v2287_v61, %v2133_v58 }
  0x33   : > { %v1923_v27 = vld [vmem:[%s2454_s2 + $0x200] sm:$0xff] }
  0x34   : > { %473 = vmatpush.bf16.msrb.mxu1 %v1864_v17  ;;  %807 = vmatpush.bf16.msrb.mxu0 %v1896_v20  ;;  %v1901_v17 = vld [vmem:[%s2454_s2 + $0x150] sm:$0xff]  ;;  %v511_v20 = vpack.c.bf16 %v2336_v15, %v2334_v14  ;;  %v1191_v58 = vld [vmem:[#allocation2 + $0x82] sm:$0xff] }
  0x35   : > { %1036 = vmatpush.bf16.msrb.mxu2 %v1912_v21  ;;  %v620_v21 = vld [vmem:[#allocation2 + $0x70] sm:$0xff] }
  0x36   : > { %1150 = vmatpush.bf16.msrb.mxu3 %v1920_v23 }
  0x38   : > { %474 = vmatpush.bf16.msrb.mxu1 %v1863_v22  ;;  %808 = vmatpush.bf16.msrb.mxu0 %v1895_v24  ;;  %v621_v22 = vld [vmem:[#allocation2 + $0x80] sm:$0xff]  ;;  %v1900_v24 = vld [vmem:[%s2454_s2 + $0x148] sm:$0xff] }
  0x39   : > { %1037 = vmatpush.bf16.msrb.mxu2 %v1911_v25  ;;  %v625_v23 = vpack.c.bf16 %v621_v22, %v620_v21  ;;  %v1925_v25 = vld [vmem:[%s2454_s2 + $0x210] sm:$0xff]  ;;  %v968_v28 = vpack.c.bf16 0.0, %v621_v22 }
  0x3a   : > { %1151 = vmatpush.bf16.msrb.mxu3 %v1919_v41 }
  0x3b   : > { %417 = vmatmul.bf16.gmra.mxu1 %v2222_v31  ;;  %407 = vmatmul.bf16.gmra.mxu0 %v2226_v32 }
  0x3c   : > { %475 = vmatpush.bf16.msrb.mxu1 %v1862_v26  ;;  %809 = vmatpush.bf16.msrb.mxu0 %v1894_v29  ;;  %v1899_v26 = vld [vmem:[%s2454_s2 + $0x140] sm:$0xff]  ;;  %v1924_v29 = vld [vmem:[%s2454_s2 + $0x208] sm:$0xff] }
  0x3d   : > { %1038 = vmatpush.bf16.msrb.mxu2 %v1910_v40 }
  0x3e   : > { %590 = vmatmul.bf16.gmra.mxu2 %v2230_v33  ;;  %1152 = vmatpush.bf16.msrb.mxu3 %v1918_v45  ;;  %v853_v45 = vpack.c.bf16 %v1191_v58, %v2336_v15 }
  0x3f   : > { %704 = vmatmul.bf16.gmra.mxu3 %v623_v39  ;;  %v1192_v39 = vld [vmem:[#allocation2 + $0x92] sm:$0xff] }
  0x40   : > { %476 = vmatpush.bf16.msrb.mxu1 %v1861_v37  ;;  %810 = vmatpush.bf16.msrb.mxu0 %v1893_v38  ;;  %v300_v37 = vpack.c.bf16 %v620_v21, %v2298_v1  ;;  %v1078_v38 = vld [vmem:[#allocation2 + $0x91] sm:$0xff] }
  0x41   : > { %1039 = vmatpush.bf16.msrb.mxu2 %v1909_v44 }
  0x42   : > { %1153 = vmatpush.bf16.msrb.mxu3 %v1917_v7 }
  0x44   : > { %477 = vmatpush.bf16.msrb.mxu1 %v1860_v42  ;;  %811 = vmatpush.bf16.msrb.mxu0 %v1892_v43 }
  0x45   : > { %1040 = vmatpush.bf16.msrb.mxu2 %v1908_v51 }
  0x46   : > { %1154 = vmatpush.bf16.msrb.mxu3 %v1916_v55 }
  0x48   : > { %478 = vmatpush.bf16.msrb.mxu1 %v1859_v48  ;;  %812 = vmatpush.bf16.msrb.mxu0 %v1891_v50 }
  0x49   : > { %1041 = vmatpush.bf16.msrb.mxu2 %v1907_v9 }
  0x4a   : > { %1155 = vmatpush.bf16.msrb.mxu3 %v1915_v30 }
  0x4b   : > { %479 = vmatmul.bf16.vlgmr.msrb.gmra.mxu1 %v297_v12  ;;  %813 = vmatmul.bf16.vlgmr.msrb.gmra.mxu0 %v736_v62 }
  0x4c   : > { %919 = vmatpush.bf16.msra.mxu1 %v1906_v49  ;;  %1262 = vmatpush.bf16.msra.mxu0 %v1930_v11 }
  0x4d   : > { %1939 = vmatpush.bf16.msra.mxu2 %v1930_v11 }
  0x4e   : > { %595 = vmatmul.bf16.gmra.mxu2 %v2296_v63 }
  0x4f   : > { %709 = vmatmul.bf16.gmra.mxu3 %v624_v56 }
  0x50   : > { %920 = vmatpush.bf16.msra.mxu1 %v1905_v60  ;;  %1263 = vmatpush.bf16.msra.mxu0 %v1929_v4 }
  0x51   : > { %1940 = vmatpush.bf16.msra.mxu2 %v1929_v4 }
  0x54   : > { %921 = vmatpush.bf16.msra.mxu1 %v1904_v2  ;;  %1264 = vmatpush.bf16.msra.mxu0 %v1928_v6 }
  0x55   : > { %1941 = vmatpush.bf16.msra.mxu2 %v1928_v6 }
  0x58   : > { %922 = vmatpush.bf16.msra.mxu1 %v1903_v34  ;;  %1265 = vmatpush.bf16.msra.mxu0 %v1927_v10 }
  0x59   : > { %1942 = vmatpush.bf16.msra.mxu2 %v1927_v10 }
  0x5b   : > { %484 = vmatmul.bf16.gmra.mxu1 %v298_v18  ;;  %818 = vmatmul.bf16.gmra.mxu0 %v737_v19 }
  0x5c   : > { %923 = vmatpush.bf16.msra.mxu1 %v1902_v13  ;;  %1266 = vmatpush.bf16.msra.mxu0 %v1926_v16 }
  0x5d   : > { %1943 = vmatpush.bf16.msra.mxu2 %v1926_v16 }
  0x5e   : > { %600 = vmatmul.bf16.gmra.mxu2 %v511_v20 }
  0x5f   : > { %714 = vmatmul.bf16.gmra.mxu3 %v625_v23 }
  0x60   : > { %924 = vmatpush.bf16.msra.mxu1 %v1901_v17  ;;  %1267 = vmatpush.bf16.msra.mxu0 %v1925_v25 }
  0x61   : > { %1944 = vmatpush.bf16.msra.mxu2 %v1925_v25 }
  0x64   : > { %925 = vmatpush.bf16.msra.mxu1 %v1900_v24  ;;  %1268 = vmatpush.bf16.msra.mxu0 %v1924_v29 }
  0x65   : > { %1945 = vmatpush.bf16.msra.mxu2 %v1924_v29 }
  0x68   : > { %926 = vmatpush.bf16.msra.mxu1 %v1899_v26  ;;  %1269 = vmatpush.bf16.msra.mxu0 %v1923_v27 }
  0x69   : > { %1946 = vmatpush.bf16.msra.mxu2 %v1923_v27 }
  0x6b   : > { %489 = vmatmul.bf16.gmra.mxu1 %v299_v8  ;;  %823 = vmatmul.bf16.gmra.mxu0 %v738_v5 }
  0x6e   : > { %1042 = vmatmul.bf16.vlgmr.msrb.gmra.mxu2 %v298_v18 }
  0x6f   : > { %1156 = vmatmul.bf16.vlgmr.msrb.gmra.mxu3 %v2226_v32  ;;  %v1082_v32 = vpack.c.bf16 %v1078_v38, %v2287_v61 }
  0x7b   : > { %494 = vmatmul.bf16.gmra.mxu1 %v300_v37  ;;  %828 = vmatmul.bf16.gmra.mxu0 %v739_v36 }
  0x7e   : > { %1047 = vmatmul.bf16.gmra.mxu2 %v299_v8 }
  0x7f   : > { %1161 = vmatmul.bf16.gmra.mxu3 %v2158_v3  ;;  %v852_v3 = vpack.c.bf16 %v2334_v14, %v2282_v57 }
  0x8b   : > { %927 = vmatmul.bf16.vlgmr.msra.gmra.mxu1 %v850_v59  ;;  %1270 = vmatmul.bf16.vlgmr.msra.gmra.mxu0 %v2230_v33  ;;  %v1196_v33 = vpack.c.bf16 %v1192_v39, %v1191_v58 }
  0x8e   : > { %1052 = vmatmul.bf16.gmra.mxu2 %v300_v37 }
  0x8f   : > { %1166 = vmatmul.bf16.gmra.mxu3 %v2222_v31 }
  0x9b   : > { %932 = vmatmul.bf16.gmra.mxu1 %v851_v35  ;;  %1275 = vmatmul.bf16.gmra.mxu0 %v2296_v63 }
  0x9e   : > { %1057 = vmatmul.bf16.gmra.mxu2 %v968_v28 }
  0x9f   : > { %1171 = vmatmul.bf16.gmra.mxu3 %v1082_v32 }
  0xa8   : > { %v413_v40 = vpop.f32.mrf.mxu1  ;;  %v403_v41 = vpop.f32.mrf.mxu0 }
  0xab   : > { %937 = vmatmul.bf16.gmra.mxu1 %v852_v3  ;;  %1280 = vmatmul.bf16.gmra.mxu0 %v511_v20 }
  0xae   : > { %1285 = vmatmul.bf16.vlgmr.msra.gmra.mxu2 %v1196_v33 }
  0xb0   : > { %v415_v42 = vpop.f32.mrf.mxu1  ;;  %v405_v43 = vpop.f32.mrf.mxu0 }
  0xb1   : > { %v586_v31 = vpop.f32.mrf.mxu2 }
  0xb2   : > { %v700_v44 = vpop.f32.mrf.mxu3 }
  0xb8   : > { %v418_v47 = vpop.f32.mrf.mxu1  ;;  %v408_v48 = vpop.f32.mrf.mxu0 }
  0xb9   : > { %v588_v46 = vpop.f32.mrf.mxu2 }
  0xba   : > { %v702_v49 = vpop.f32.mrf.mxu3 }
  0xbb   : > { %942 = vmatmul.bf16.gmra.mxu1 %v853_v45 }
  0xc0   : > { %v420_v52 = vpop.f32.mrf.mxu1  ;;  %v410_v11 = vpop.f32.mrf.mxu0 }
  0xc1   : > { %v591_v50 = vpop.f32.mrf.mxu2 }
  0xc2   : > { %v2385_v53 = vpop.f32.mrf.mxu3 }
  0xc8   : > { %v480_v57 = vpop.f32.mrf.mxu1  ;;  %v814_v60 = vpop.f32.mrf.mxu0 }
  0xc9   : > { %v593_v54 = vpop.f32.mrf.mxu2  ;;  %v481_v61 = vadd.f32 %v480_v57, %v403_v41 }
  0xca   : > { %v2387_v62 = vpop.f32.mrf.mxu3 }
  0xcb   : > { %v606_v12 = vadd.f32 %v586_v31, %v481_v61 }
  0xcd   : > { %v720_v58 = vadd.f32 %v700_v44, %v606_v12 }
  0xcf   : > { %v834_v3 = vadd.f32 %v814_v60, %v720_v58 }
  0xd0   : > { %v482_v0 = vpop.f32.mrf.mxu1  ;;  %v816_v1 = vpop.f32.mrf.mxu0 }
  0xd1   : > { %v596_v63 = vpop.f32.mrf.mxu2  ;;  %v483_v4 = vadd.f32 %v482_v0, %v405_v43 }
  0xd2   : > { %v2389_v51 = vpop.f32.mrf.mxu3 }
  0xd3   : > { %v607_v2 = vadd.f32 %v588_v46, %v483_v4 }
  0xd5   : > { %v721_v43 = vadd.f32 %v702_v49, %v607_v2 }
  0xd8   : > { %v485_v5 = vpop.f32.mrf.mxu1  ;;  %v819_v6 = vpop.f32.mrf.mxu0 }
  0xd9   : > { %v598_v56 = vpop.f32.mrf.mxu2  ;;  %v486_v7 = vadd.f32 %v485_v5, %v408_v48 }
  0xda   : > { %v2391_v55 = vpop.f32.mrf.mxu3 }
  0xdb   : > { %v608_v9 = vadd.f32 %v591_v50, %v486_v7 }
  0xe0   : > { %v487_v10 = vpop.f32.mrf.mxu1  ;;  %v2393_v13 = vpop.f32.mrf.mxu0 }
  0xe1   : > { %v601_v34 = vpop.f32.mrf.mxu2  ;;  %v488_v14 = vadd.f32 %v487_v10, %v410_v11 }
  0xe2   : > { %v2397_v21 = vpop.f32.mrf.mxu3 }
  0xe3   : > { %v609_v15 = vadd.f32 %v593_v54, %v488_v14  ;;  %v722_v54 = vadd.f32 %v2385_v53, %v608_v9 }
  0xe5   : > { %v836_v61 = vadd.f32 %v819_v6, %v722_v54  ;;  %v723_v5 = vadd.f32 %v2387_v62, %v609_v15 }
  0xe7   : > { %v837_v9 = vadd.f32 %v2393_v13, %v723_v5 }
  0xe8   : > { %v490_v18 = vpop.f32.mrf.mxu1  ;;  %v2395_v19 = vpop.f32.mrf.mxu0 }
  0xe9   : > { %v603_v17 = vpop.f32.mrf.mxu2  ;;  %v491_v20 = vadd.f32 %v490_v18, %v413_v40 }
  0xea   : > { %v2405_v25 = vpop.f32.mrf.mxu3 }
  0xeb   : > { %v2399_v22 = vadd.f32 %v596_v63, %v491_v20 }
  0xf0   : > { %v492_v24 = vpop.f32.mrf.mxu1  ;;  %v2401_v16 = vpop.f32.mrf.mxu0 }
  0xf1   : > { %v1043_v23 = vpop.f32.mrf.mxu2  ;;  %v493_v30 = vadd.f32 %v492_v24, %v415_v42 }
  0xf2   : > { %v1157_v37 = vpop.f32.mrf.mxu3 }
  0xf3   : > { %v2403_v59 = vadd.f32 %v598_v56, %v493_v30  ;;  %v724_v30 = vadd.f32 %v2389_v51, %v2399_v22 }
  0xf8   : > { %v495_v29 = vpop.f32.mrf.mxu1  ;;  %v2407_v8 = vpop.f32.mrf.mxu0 }
  0xf9   : > { %v1045_v26 = vpop.f32.mrf.mxu2  ;;  %v496_v27 = vadd.f32 %v495_v29, %v418_v47  ;;  %v835_v47 = vadd.f32 %v816_v1, %v721_v43 }
  0xfa   : > { %v1159_v40 = vpop.f32.mrf.mxu3 }
  0xfb   : > { %v2409_v35 = vadd.f32 %v601_v34, %v496_v27  ;;  %v838_v27 = vadd.f32 %v2395_v19, %v724_v30 }
 0x100   : > { %v497_v28 = vpop.f32.mrf.mxu1  ;;  %v2411_v38 = vpop.f32.mrf.mxu0 }
 0x101   : > { %v1048_v36 = vpop.f32.mrf.mxu2  ;;  %v498_v32 = vadd.f32 %v497_v28, %v420_v52 }
 0x102   : > { %v1162_v11 = vpop.f32.mrf.mxu3 }
 0x103   : > { %v2413_v39 = vadd.f32 %v603_v17, %v498_v32 }
 0x108   : > { %v928_v41 = vpop.f32.mrf.mxu1  ;;  %v1271_v33 = vpop.f32.mrf.mxu0 }
 0x109   : > { %v948_v31 = vadd.f32 %v928_v41, %v834_v3  ;;  %v1050_v42 = vpop.f32.mrf.mxu2 }
 0x10a   : > { %v1164_v10 = vpop.f32.mrf.mxu3 }
 0x10b   : > { %v1063_v45 = vadd.f32 %v1043_v23, %v948_v31 }
 0x10d   : > { %v1177_v46 = vadd.f32 %v1157_v37, %v1063_v45 }
 0x10f   : > { %v1291_v44 = vadd.f32 %v1271_v33, %v1177_v46 }
 0x110   : > { %v930_v48 = vpop.f32.mrf.mxu1  ;;  %v1273_v50 = vpop.f32.mrf.mxu0 }
 0x111   : > { %1299 = vst [vmem:[%s2420_s9] sm:$0xff] %v1291_v44  ;;  %v949_v52 = vadd.f32 %v930_v48, %v835_v47  ;;  %v1053_v57 = vpop.f32.mrf.mxu2  ;;  %v1321_v4 = vmul.f32 %v1291_v44, %v1291_v44 }
 0x112   : > { %v1167_v29 = vpop.f32.mrf.mxu3 }
 0x113   : > { %v1064_v49 = vadd.f32 %v1045_v26, %v949_v52 }
 0x115   : > { %v1178_v60 = vadd.f32 %v1159_v40, %v1064_v49  ;;  %v725_v40 = vadd.f32 %v2391_v55, %v2403_v59 }
 0x117   : > { %v1292_v12 = vadd.f32 %v1273_v50, %v1178_v60  ;;  %v839_v33 = vadd.f32 %v2401_v16, %v725_v40 }
 0x118   : > { %v933_v63 = vpop.f32.mrf.mxu1  ;;  %v1276_v0 = vpop.f32.mrf.mxu0 }
 0x119   : > { %1300 = vst [vmem:[%s2420_s9 + $0x8] sm:$0xff] %v1292_v12  ;;  %v1307_v1 = vadd.f32 %v1292_v12, %v1291_v44  ;;  %v1322_v2 = vmul.f32 %v1292_v12, %v1292_v12  ;;  %v950_v56 = vadd.f32 %v933_v63, %v836_v61  ;;  %v1055_v53 = vpop.f32.mrf.mxu2  ;;  %v726_v44 = vadd.f32 %v2397_v21, %v2409_v35 }
 0x11a   : > { %v1169_v19 = vpop.f32.mrf.mxu3  ;;  %v727_v61 = vadd.f32 %v2405_v25, %v2413_v39 }
 0x11b   : > { %v1329_v7 = vadd.f32 %v1322_v2, %v1321_v4  ;;  %v1065_v34 = vadd.f32 %v1048_v36, %v950_v56  ;;  %v840_v52 = vadd.f32 %v2407_v8, %v726_v44 }
 0x11d   : > { %v1179_v14 = vadd.f32 %v1162_v11, %v1065_v34 }
 0x11f   : > { %v1293_v17 = vadd.f32 %v1276_v0, %v1179_v14  ;;  %v841_v0 = vadd.f32 %v2411_v38, %v727_v61 }
 0x120   : > { %v935_v6 = vpop.f32.mrf.mxu1  ;;  %v1278_v18 = vpop.f32.mrf.mxu0 }
 0x121   : > { %1301 = vst [vmem:[%s2420_s9 + $0x10] sm:$0xff] %v1293_v17  ;;  %v1308_v20 = vadd.f32 %v1307_v1, %v1293_v17  ;;  %v1323_v23 = vmul.f32 %v1293_v17, %v1293_v17  ;;  %v951_v24 = vadd.f32 %v935_v6, %v837_v9  ;;  %v1058_v13 = vpop.f32.mrf.mxu2 }
 0x122   : > { %v1172_v60 = vpop.f32.mrf.mxu3 }
 0x123   : > { %v1330_v26 = vadd.f32 %v1329_v7, %v1323_v23  ;;  %v1066_v62 = vadd.f32 %v1050_v42, %v951_v24 }
 0x125   : > { %v1180_v15 = vadd.f32 %v1164_v10, %v1066_v62 }
 0x127   : > { %v1294_v37 = vadd.f32 %v1278_v18, %v1180_v15 }
 0x128   : > { %v938_v36 = vpop.f32.mrf.mxu1  ;;  %v1281_v3 = vpop.f32.mrf.mxu0 }
 0x129   : > { %1302 = vst [vmem:[%s2420_s9 + $0x18] sm:$0xff] %v1294_v37  ;;  %v1309_v28 = vadd.f32 %v1308_v20, %v1294_v37  ;;  %v1324_v32 = vmul.f32 %v1294_v37, %v1294_v37  ;;  %v952_v58 = vadd.f32 %v938_v36, %v838_v27  ;;  %v1060_v47 = vpop.f32.mrf.mxu2 }
 0x12a   : > { %v1174_v34 = vpop.f32.mrf.mxu3 }
 0x12b   : > { %v1331_v41 = vadd.f32 %v1330_v26, %v1324_v32  ;;  %v1067_v51 = vadd.f32 %v1053_v57, %v952_v58 }
 0x12d   : > { %v1181_v22 = vadd.f32 %v1167_v29, %v1067_v51 }
 0x12f   : > { %v1295_v31 = vadd.f32 %v1281_v3, %v1181_v22 }
 0x130   : > { %v940_v42 = vpop.f32.mrf.mxu1  ;;  %v1283_v55 = vpop.f32.mrf.mxu0 }
 0x131   : > { %1303 = vst [vmem:[%s2420_s9 + $0x20] sm:$0xff] %v1295_v31  ;;  %v1310_v43 = vadd.f32 %v1309_v28, %v1295_v31  ;;  %v1325_v45 = vmul.f32 %v1295_v31, %v1295_v31  ;;  %v953_v46 = vadd.f32 %v940_v42, %v839_v33  ;;  %v1286_v21 = vpop.f32.mrf.mxu2 }
 0x133   : > { %v1332_v48 = vadd.f32 %v1331_v41, %v1325_v45  ;;  %v1068_v50 = vadd.f32 %v1055_v53, %v953_v46 }
 0x135   : > { %v1182_v59 = vadd.f32 %v1169_v19, %v1068_v50 }
 0x137   : > { %v1296_v16 = vadd.f32 %v1283_v55, %v1182_v59 }
 0x138   : > { %v943_v11 = vpop.f32.mrf.mxu1 }
 0x139   : > { %1304 = vst [vmem:[%s2420_s9 + $0x28] sm:$0xff] %v1296_v16  ;;  %v1311_v54 = vadd.f32 %v1310_v43, %v1296_v16  ;;  %v1326_v49 = vmul.f32 %v1296_v16, %v1296_v16  ;;  %v954_v57 = vadd.f32 %v943_v11, %v840_v52  ;;  %v1288_v14 = vpop.f32.mrf.mxu2 }
 0x13b   : > { %v1333_v12 = vadd.f32 %v1332_v48, %v1326_v49  ;;  %v1069_v63 = vadd.f32 %v1058_v13, %v954_v57 }
 0x13d   : > { %v1183_v35 = vadd.f32 %v1172_v60, %v1069_v63 }
 0x13f   : > { %v1297_v4 = vadd.f32 %v1286_v21, %v1183_v35 }
 0x140   : > { %v945_v8 = vpop.f32.mrf.mxu1 }
 0x141   : > { %1305 = vst [vmem:[%s2420_s9 + $0x30] sm:$0xff] %v1297_v4  ;;  %v1312_v1 = vadd.f32 %v1311_v54, %v1297_v4  ;;  %v1327_v2 = vmul.f32 %v1297_v4, %v1297_v4  ;;  %v955_v56 = vadd.f32 %v945_v8, %v841_v0 }
 0x143   : > { %v1334_v5 = vadd.f32 %v1333_v12, %v1327_v2  ;;  %v1070_v7 = vadd.f32 %v1060_v47, %v955_v56 }
 0x145   : > { %v1184_v10 = vadd.f32 %v1174_v34, %v1070_v7 }
 0x147   : > { %v1298_v25 = vadd.f32 %v1288_v14, %v1184_v10 }
 0x149   : > { %1306 = vst [vmem:[%s2420_s9 + $0x38] sm:$0xff] %v1298_v25  ;;  %v1313_v39 = vadd.f32 %v1312_v1, %v1298_v25  ;;  %v1328_v53 = vmul.f32 %v1298_v25, %v1298_v25 }
 0x14b   : > { %v1314_v9 = vrot.slane %v1313_v39, 4  ;;  %v1335_v17 = vadd.f32 %v1334_v5, %v1328_v53 }
 0x14d   : > { %v1315_v6 = vadd.f32 %v1314_v9, %v1313_v39  ;;  %v1336_v38 = vrot.slane %v1335_v17, 4 }
 0x14f   : > { %v1316_v18 = vrot.slane %v1315_v6, 2  ;;  %v1337_v20 = vadd.f32 %v1336_v38, %v1335_v17 }
 0x151   : > { %v1317_v23 = vadd.f32 %v1316_v18, %v1315_v6  ;;  %v1338_v24 = vrot.slane %v1337_v20, 2 }
 0x153   : > { %v1318_v30 = vrot.slane %v1317_v23, 1  ;;  %v1339_v26 = vadd.f32 %v1338_v24, %v1337_v20 }
 0x155   : > { %v1319_v62 = vadd.f32 %v1318_v30, %v1317_v23  ;;  %v1340_v15 = vrot.slane %v1339_v26, 1 }
 0x157   : > { %1320 = vst [vmem:[%s208_s12] sm:$0x1] %v1319_v62  ;;  %v1341_v29 = vadd.f32 %v1340_v15, %v1339_v26 }
 0x159   : > { %1342 = vst [vmem:[%s208_s12 + $0x1] sm:$0x1] %v1341_v29 }
 0x15a PF: > { %s15_s15 = sadd.s32 1, %s1962_s15  }
 0x15b   : > { %p12_p4 = scmp.ge.s32.totalorder %s15_s15, 4  }
 0x15d   :  { %14 = sbr.rel (!%p12_p4) target bundleno = 1 (0x1), region = 84 }

</bundles_post_ra>
